<compile_context>
chip_gen: v7x
topology: tpu7x:2x2x1
jax: 0.10.0
libtpu: 0.0.40
codegen_flags: <defaults>
</compile_context>

<pallas_src>
import math

import jax
import jax.numpy as jnp
from jax import lax
from jax.experimental import pallas as pl
from jax.experimental.pallas import tpu as pltpu


# ---------------------------------------------------------------------------
# Conservative VMEM budgeting (works on v5e/v6e 128 MiB and v7x 64 MiB per TC).
# ---------------------------------------------------------------------------
_VMEM_LIMIT_BYTES = 48 * 1024 * 1024   # explicit scoped-VMEM limit for every call
_BUF_BUDGET_BYTES = 28 * 1024 * 1024   # budget for the pipelined in/out buffers


def _largest_div_mult8(n, cap):
    """Largest divisor of n that is a multiple of 8 and <= cap (0 if none exists)."""
    cap = min(cap, n)
    t = (cap // 8) * 8
    while t >= 8:
        if n % t == 0:
            return t
        t -= 8
    return 0


def _pick_batch_tile(b):
    """Gate-output block rule: (tb, C) needs tb % 8 == 0 or tb == B."""
    if b % 8 == 0:
        return 8 if b >= 16 else b   # tb=8 keeps the batch grid axis >= 2 when B >= 16
    return b


def _pick_gate_seq_tile(n, c, tb, itemsize, budget=_BUF_BUDGET_BYTES):
    # 2x pipelined x tile + f32 working copy headroom, per sequence row.
    bytes_per_row = tb * c * (2 * itemsize + 4)
    cap = max(8, budget // max(bytes_per_row, 1))
    tn = _largest_div_mult8(n, cap)
    # TODO(synk): pad/mask path for awkward N with no multiple-of-8 divisor under budget.
    return tn if tn else n


def _pick_scale_seq_tile(n, c, tb, itemsize, budget=_BUF_BUDGET_BYTES):
    # 2x pipelined input + 2x pipelined output, per sequence row.
    bytes_per_row = tb * c * (4 * itemsize)
    cap = max(8, budget // max(bytes_per_row, 1))
    tn = _largest_div_mult8(n, cap)
    return tn if tn else n


def _pick_fused_batch_tile(b, n, c, itemsize, budget=_BUF_BUDGET_BYTES):
    """Batch tile for the fused kernel, or None if even tb=1 does not fit the budget."""
    # 2x pipelined input slab + 2x pipelined output slab + f32 temp headroom, per row.
    bytes_per_row = n * c * (4 * itemsize + 4)
    if bytes_per_row > budget:
        return None
    max_tb = int(budget // bytes_per_row)
    divs = [d for d in range(1, b + 1) if b % d == 0 and d <= max_tb]
    if not divs:
        return None
    par = [d for d in divs if b // d >= 2]   # keep grid extent >= 2 for v7x megacore
    return max(par) if par else max(divs)


# ---------------------------------------------------------------------------
# Fused single-pass kernel: read x once, compute gate, scale, write out.
# ---------------------------------------------------------------------------
def se_fused_pallas(x, w1, w2t, tb):
    """out = x * sigmoid(relu(mean_N(x) @ W1^T) @ W2^T)[:, None, :]  (one HBM pass)."""
    B, N, C = x.shape
    H = w1.shape[0]
    assert B % tb == 0
    inv_n = 1.0 / float(N)
    fold8 = (N % 8 == 0)

    def kernel(x_ref, w1_ref, w2_ref, o_ref):
        xs = x_ref[...].astype(jnp.float32)                           # (tb, N, C)
        if fold8:
            # VALU-only partial sums over N//8 groups, one XLU sublane fold at the end.
            part = jnp.sum(xs.reshape(tb, N // 8, 8, C), axis=1)      # (tb, 8, C)
            mean = jnp.sum(part, axis=1) * inv_n                      # (tb, C)
        else:
            mean = jnp.sum(xs, axis=1) * inv_n
        # Lane-dense weights: W1 is (H, C); contract the C axis of both operands.
        h = jnp.maximum(
            lax.dot_general(mean, w1_ref[...], (((1,), (1,)), ((), ())),
                            preferred_element_type=jnp.float32),
            0.0)                                                      # (tb, H)
        g = jax.nn.sigmoid(
            jnp.dot(h, w2_ref[...], preferred_element_type=jnp.float32))  # (tb, C)
        o_ref[...] = (x_ref[...] * g.astype(o_ref.dtype)[:, None, :]).astype(o_ref.dtype)

    itemsize = x.dtype.itemsize
    cost = pl.CostEstimate(
        flops=2 * B * N * C + 2 * B * C * H + 2 * B * H * C,
        transcendentals=B * C,
        bytes_accessed=2 * x.size * itemsize + (w1.size + w2t.size) * 4,
    )

    return pl.pallas_call(
        kernel,
        out_shape=jax.ShapeDtypeStruct((B, N, C), x.dtype),
        grid_spec=pltpu.PrefetchScalarGridSpec(
            num_scalar_prefetch=0,
            grid=(B // tb,),
            in_specs=[
                pl.BlockSpec((tb, N, C), lambda b: (b, 0, 0)),   # x slab, resident per step
                pl.BlockSpec((H, C), lambda b: (0, 0)),          # W1 (lane-dense)
                pl.BlockSpec((H, C), lambda b: (0, 0)),          # W2^T (lane-dense)
            ],
            out_specs=pl.BlockSpec((tb, N, C), lambda b: (b, 0, 0)),
        ),
        compiler_params=pltpu.CompilerParams(
            dimension_semantics=("parallel",),
            vmem_limit_bytes=_VMEM_LIMIT_BYTES),
        cost_estimate=cost,
    )(x, w1, w2t)


# ---------------------------------------------------------------------------
# Fallback path (slab too big for VMEM): gate reduction kernel + scale kernel.
# ---------------------------------------------------------------------------
def se_gate_pallas(x, w1, w2t, tb, tn):
    """y = sigmoid( relu( mean_N(x) @ W1^T ) @ W2^T ), shape (B, C), f32."""
    B, N, C = x.shape
    H = w1.shape[0]
    assert N % tn == 0 and B % tb == 0
    inv_n = 1.0 / float(N)
    grid = (B // tb, N // tn)
    use_fold = (tn % 8 == 0)
    acc_shape = (tb, 8, C) if use_fold else (tb, C)

    def kernel(x_ref, w1_ref, w2_ref, y_ref, acc_ref):
        n = pl.program_id(1)

        @pl.when(n == 0)
        def _():
            acc_ref[...] = jnp.zeros_like(acc_ref)

        xs = x_ref[...].astype(jnp.float32)
        if use_fold:
            # Per-step work stays in the VALU slot (plain vreg adds).
            acc_ref[...] += jnp.sum(xs.reshape(tb, tn // 8, 8, C), axis=1)
        else:
            acc_ref[...] += jnp.sum(xs, axis=1)

        @pl.when(n == pl.num_programs(1) - 1)
        def _():
            if use_fold:
                mean = jnp.sum(acc_ref[...], axis=1) * inv_n       # single XLU fold
            else:
                mean = acc_ref[...] * inv_n
            h = jnp.maximum(
                lax.dot_general(mean, w1_ref[...], (((1,), (1,)), ((), ())),
                                preferred_element_type=jnp.float32),
                0.0)                                               # (tb, H)
            g = jnp.dot(h, w2_ref[...], preferred_element_type=jnp.float32)
            y_ref[...] = jax.nn.sigmoid(g).astype(y_ref.dtype)     # (tb, C)

    itemsize = x.dtype.itemsize
    cost = pl.CostEstimate(
        flops=B * N * C + 2 * B * C * H + 2 * B * H * C,
        transcendentals=B * C,
        bytes_accessed=x.size * itemsize + (w1.size + w2t.size + B * C) * 4,
    )

    return pl.pallas_call(
        kernel,
        out_shape=jax.ShapeDtypeStruct((B, C), jnp.float32),
        grid_spec=pltpu.PrefetchScalarGridSpec(
            num_scalar_prefetch=0,
            grid=grid,
            in_specs=[
                pl.BlockSpec((tb, tn, C), lambda b, n: (b, n, 0)),  # x tile
                pl.BlockSpec((H, C), lambda b, n: (0, 0)),          # W1 resident
                pl.BlockSpec((H, C), lambda b, n: (0, 0)),          # W2^T resident
            ],
            out_specs=pl.BlockSpec((tb, C), lambda b, n: (b, 0)),   # resident over N
            scratch_shapes=[pltpu.VMEM(acc_shape, jnp.float32)],
        ),
        compiler_params=pltpu.CompilerParams(
            dimension_semantics=("parallel", "arbitrary"),
            vmem_limit_bytes=_VMEM_LIMIT_BYTES),
        cost_estimate=cost,
    )(x, w1, w2t)


def se_scale_pallas(x, y, tb, tn):
    """out = x * y[:, None, :], tiled over (B, N); fully parallel grid."""
    B, N, C = x.shape
    assert N % tn == 0 and B % tb == 0
    grid = (B // tb, N // tn)

    def kernel(x_ref, y_ref, o_ref):
        o_ref[...] = (x_ref[...] * y_ref[...].astype(o_ref.dtype)[:, None, :]
                      ).astype(o_ref.dtype)

    itemsize = x.dtype.itemsize
    cost = pl.CostEstimate(
        flops=B * N * C,
        transcendentals=0,
        bytes_accessed=2 * x.size * itemsize + y.size * 4,
    )

    return pl.pallas_call(
        kernel,
        out_shape=jax.ShapeDtypeStruct((B, N, C), x.dtype),
        grid_spec=pltpu.PrefetchScalarGridSpec(
            num_scalar_prefetch=0,
            grid=grid,
            in_specs=[
                pl.BlockSpec((tb, tn, C), lambda b, n: (b, n, 0)),  # x tile
                pl.BlockSpec((tb, C), lambda b, n: (b, 0)),         # gate, resident over N
            ],
            out_specs=pl.BlockSpec((tb, tn, C), lambda b, n: (b, n, 0)),  # lane-dense
        ),
        compiler_params=pltpu.CompilerParams(
            dimension_semantics=("parallel", "parallel"),
            vmem_limit_bytes=_VMEM_LIMIT_BYTES),
        cost_estimate=cost,
    )(x, y)


class SELayerPallas:
    """JAX/Pallas port of the PyTorch SELayer (forward semantics preserved).

    Input x: (B, N, C). PyTorch transposes to (B, C, N), average-pools over N,
    applies Linear(C, C//r, bias=False) -> ReLU -> Linear(C//r, C, bias=False)
    -> Sigmoid, rescales channels, and transposes back. Equivalently:
        out = x * sigmoid( relu( mean_N(x) @ W1^T ) @ W2^T )[:, None, :]
    """

    def __init__(self, channel, reduction=16, key=None):
        assert channel % reduction == 0, "channel must be divisible by reduction"
        self.channel = channel
        self.hidden = channel // reduction
        key = jax.random.PRNGKey(0) if key is None else key
        k1, k2 = jax.random.split(key)
        # torch nn.Linear(in, out, bias=False): weight (out, in), U(-1/sqrt(in), 1/sqrt(in))
        b1 = 1.0 / math.sqrt(channel)
        b2 = 1.0 / math.sqrt(self.hidden)
        self.w1 = jax.random.uniform(k1, (self.hidden, channel), jnp.float32, -b1, b1)  # (H, C)
        self.w2 = jax.random.uniform(k2, (channel, self.hidden), jnp.float32, -b2, b2)  # (C, H)
        # Lane-dense kernel operands: W1 already (H, C); W2 pre-transposed to (H, C).
        self.w2t = jnp.asarray(self.w2.T)  # (H, C)

    def __call__(self, x):
        B, N, C = x.shape
        assert C == self.channel
        itemsize = x.dtype.itemsize
        tb_fused = _pick_fused_batch_tile(B, N, C, itemsize)
        if tb_fused is not None:
            # Single-pass fused kernel: x read once, out written once.
            return se_fused_pallas(x, self.w1, self.w2t, tb_fused)
        # Fallback: two passes (streamed gate reduction, then elementwise rescale).
        tb = _pick_batch_tile(B)
        tn_g = _pick_gate_seq_tile(N, C, tb, itemsize)
        tn_s = _pick_scale_seq_tile(N, C, tb, itemsize)
        y = se_gate_pallas(x, self.w1, self.w2t, tb, tn_g)   # (B, C) sigmoid gate
        return se_scale_pallas(x, y, tb, tn_s)               # (B, N, C)


def _reference(mod, x):
    """Pure-JAX reference mirroring the PyTorch forward."""
    y = jnp.mean(x, axis=1)                                  # (B, C)
    h = jnp.maximum(y @ mod.w1.T, 0.0)                       # (B, H)
    g = jax.nn.sigmoid(h @ mod.w2.T)                         # (B, C)
    return x * g[:, None, :]


if __name__ == "__main__":
    # Small but non-trivial shapes: B=2, seq N=1024, channels C=128, reduction=16 (H=8).
    B, N, C, reduction = 2, 1024, 128, 16

    mod = SELayerPallas(C, reduction=reduction, key=jax.random.PRNGKey(1))
    x = jax.random.normal(jax.random.PRNGKey(0), (B, N, C), jnp.float32)

    ref = _reference(mod, x)

    # Primary (fused single-pass) path.
    out = jax.block_until_ready(mod(x))
    assert out.shape == (B, N, C)
    assert jnp.allclose(out, ref, atol=1e-5, rtol=1e-5)

    # Also exercise the fallback two-kernel path (multi-step N reduction) for coverage.
    y_gate = se_gate_pallas(x, mod.w1, mod.w2t, tb=B, tn=256)
    out_fb = jax.block_until_ready(se_scale_pallas(x, y_gate, tb=B, tn=256))
    assert jnp.allclose(out_fb, ref, atol=1e-5, rtol=1e-5)

    print("KERNEL_OK")
</pallas_src>

<mosaic_0001>
module attributes {stable_mosaic.version = 11 : i64} {
  func.func @kernel(%arg0: i32, %arg1: memref<1x1024x128xf32, #tpu.memory_space<vmem>>, %arg2: memref<8x128xf32, #tpu.memory_space<vmem>>, %arg3: memref<8x128xf32, #tpu.memory_space<vmem>>, %arg4: memref<1x1024x128xf32, #tpu.memory_space<vmem>>) attributes {dimension_semantics = [#tpu.dimension_semantics<parallel>], iteration_bounds = array<i64: 2>, scalar_prefetch = 0 : i64, scratch_operands = 0 : i64, tpu.core_type = #tpu.core_type<tc>, window_params = [{transform_indices = @transform_0, window_bounds = array<i64: 1, 1024, 128>}, {pipeline_mode = #tpu.pipeline_mode<synchronous>, transform_indices = @transform_1, window_bounds = array<i64: 8, 128>}, {pipeline_mode = #tpu.pipeline_mode<synchronous>, transform_indices = @transform_2, window_bounds = array<i64: 8, 128>}, {transform_indices = @transform_3, window_bounds = array<i64: 1, 1024, 128>}]} {
    %c0 = arith.constant 0 : index
    %c0_0 = arith.constant 0 : index
    %c0_1 = arith.constant 0 : index
    %0 = vector.load %arg1[%c0, %c0_0, %c0_1] : memref<1x1024x128xf32, #tpu.memory_space<vmem>>, vector<1x1024x128xf32>
    %1 = vector.shape_cast %0 : vector<1x1024x128xf32> to vector<1x128x8x128xf32>
    %cst = arith.constant dense<0.000000e+00> : vector<1x8x128xf32>
    %2 = vector.multi_reduction <add>, %1, %cst [1] : vector<1x128x8x128xf32> to vector<1x8x128xf32>
    %cst_2 = arith.constant dense<0.000000e+00> : vector<1x128xf32>
    %3 = vector.multi_reduction <add>, %2, %cst_2 [1] : vector<1x8x128xf32> to vector<1x128xf32>
    %cst_3 = arith.constant 9.765625E-4 : f32
    %4 = vector.broadcast %cst_3 : f32 to vector<1x128xf32>
    %5 = arith.mulf %3, %4 : vector<1x128xf32>
    %c0_4 = arith.constant 0 : index
    %c0_5 = arith.constant 0 : index
    %6 = vector.load %arg2[%c0_4, %c0_5] : memref<8x128xf32, #tpu.memory_space<vmem>>, vector<8x128xf32>
    %cst_6 = arith.constant dense<0.000000e+00> : vector<1x8xf32>
    %7 = tpu.matmul %5, %6, %cst_6 {dimension_numbers = #tpu.dot_dimension_numbers<[1], [1], [0], [0], [0, 0, 1, 0], [], []>} : vector<1x128xf32>, vector<8x128xf32>, vector<1x8xf32> -> vector<1x8xf32>
    %cst_7 = arith.constant 0.000000e+00 : f32
    %8 = vector.broadcast %cst_7 : f32 to vector<1x8xf32>
    %9 = arith.maximumf %7, %8 : vector<1x8xf32>
    %c0_8 = arith.constant 0 : index
    %c0_9 = arith.constant 0 : index
    %10 = vector.load %arg3[%c0_8, %c0_9] : memref<8x128xf32, #tpu.memory_space<vmem>>, vector<8x128xf32>
    %cst_10 = arith.constant dense<0.000000e+00> : vector<1x128xf32>
    %11 = tpu.matmul %9, %10, %cst_10 {dimension_numbers = #tpu.dot_dimension_numbers<[1], [0], [0], [1], [0, 0, 1, 1], [], []>} : vector<1x8xf32>, vector<8x128xf32>, vector<1x128xf32> -> vector<1x128xf32>
    %12 = arith.negf %11 : vector<1x128xf32>
    %13 = math.exp %12 : vector<1x128xf32>
    %cst_11 = arith.constant 1.000000e+00 : f32
    %14 = vector.broadcast %cst_11 : f32 to vector<1x128xf32>
    %15 = arith.addf %14, %13 : vector<1x128xf32>
    %16 = arith.divf %14, %15 : vector<1x128xf32>
    %c0_12 = arith.constant 0 : index
    %c0_13 = arith.constant 0 : index
    %c0_14 = arith.constant 0 : index
    %17 = vector.load %arg1[%c0_12, %c0_13, %c0_14] : memref<1x1024x128xf32, #tpu.memory_space<vmem>>, vector<1x1024x128xf32>
    %18 = vector.shape_cast %16 : vector<1x128xf32> to vector<1x1x128xf32>
    %19 = vector.broadcast %18 : vector<1x1x128xf32> to vector<1x1024x128xf32>
    %20 = arith.mulf %17, %19 : vector<1x1024x128xf32>
    %c0_15 = arith.constant 0 : index
    %c0_16 = arith.constant 0 : index
    %c0_17 = arith.constant 0 : index
    %21 = vector.load %arg4[%c0_15, %c0_16, %c0_17] : memref<1x1024x128xf32, #tpu.memory_space<vmem>>, vector<1x1024x128xf32>
    tpu.vector_store %arg4[%c0_15, %c0_16, %c0_17], %20 {strides = array<i32>} : memref<1x1024x128xf32, #tpu.memory_space<vmem>>, vector<1x1024x128xf32>,
    return
  }
  func.func @transform_0(%arg0: i32) -> (i32, i32, i32) {
    %c0_i32 = arith.constant 0 : i32
    %c0_i32_0 = arith.constant 0 : i32
    %c0_i32_1 = arith.constant 0 : i32
    return %arg0, %c0_i32, %c0_i32_0 : i32, i32, i32
  }
  func.func @transform_1(%arg0: i32) -> (i32, i32) {
    %c0_i32 = arith.constant 0 : i32
    %c0_i32_0 = arith.constant 0 : i32
    %c0_i32_1 = arith.constant 0 : i32
    return %c0_i32, %c0_i32_0 : i32, i32
  }
  func.func @transform_2(%arg0: i32) -> (i32, i32) {
    %c0_i32 = arith.constant 0 : i32
    %c0_i32_0 = arith.constant 0 : i32
    %c0_i32_1 = arith.constant 0 : i32
    return %c0_i32, %c0_i32_0 : i32, i32
  }
  func.func @transform_3(%arg0: i32) -> (i32, i32, i32) {
    %c0_i32 = arith.constant 0 : i32
    %c0_i32_0 = arith.constant 0 : i32
    %c0_i32_1 = arith.constant 0 : i32
    return %arg0, %c0_i32, %c0_i32_0 : i32, i32, i32
  }
}

</mosaic_0001>

<bundles_post_ra>
// kernel: tpu_custom_call.1
= control target key start
LH: loop header
LB: loop body
LE: loop exit
PB: predicated region body
PF: predicated region fallthrough
CT: control target
= control target key end

     0   :  { %8 = vsyncpa [#allocation3], 0  ;;  %s2434_s0 = inlined_call_operand.hbm [shape: f32[2,1024,128], index: 0, kind: input, shape index: {}]   ;;  %s2435_s1 = inlined_call_operand.hbm [shape: f32[8,128], index: 1, kind: input, shape index: {}]   ;;  %s2436_s2 = inlined_call_operand.hbm [shape: f32[8,128], index: 2, kind: input, shape index: {}]   ;;  %s2437_s3 = inlined_call_operand.hbm [shape: f32[2,1024,128], index: 3, kind: output, shape index: {}]  }
   0x1   :  { %10 = vsyncpa [#allocation3 + $0x1], 0 }
   0x2   :  { %11 = vsyncpa [#allocation6], 0 }
   0x3   :  { %12 = vsyncpa [#allocation4], 0 }
   0x4   :  { %14 = vsyncpa [#allocation4 + $0x1], 0  ;;  %s1296_s12 = smov 0   ;;  %s1298_s13 = smov 0  }
   0x5   :  { %s1300_s14 = smov 0   ;;  %s1302_s15 = smov 0  }
   0x6 LB: > { %s1317_s16 = sadd.s32 4294967295, %s1264_s15   ;;  %s995_s17 = sadd.s32 4294967294, %s1264_s15   ;;  %s1264_s15 = sphi %s1302_s15, %s2705_s15   ;;  %s1260_s14 = sphi %s1300_s14, %s2704_s14   ;;  %s1256_s13 = sphi %s1298_s13, %s2703_s13   ;;  %s1252_s12 = sphi %s1296_s12, %s2702_s12  }
   0x7   : > { %s1321_s18 = sadd.s32 1, %s1264_s15   ;;  %s27_s19 = sadd.s32 1, %s1260_s14 }
   0x8   : > { %s24_s20 = ssub.s32 %s1264_s15, %s1321_s18  ;;  %p34_p0 = scmp.ne.s32.totalorder %s1260_s14, %s1256_s13 }
   0x9   : > { %p25_p1 = scmp.eq.s32.totalorder %s24_s20, 0  ;;  %p35_p2 = scmp.eq.s32.totalorder %s1264_s15, 0 }
   0xa   : > { %p40_p3 = scmp.ne.s32.totalorder %s1256_s13, %s1252_s12  ;;  %p2438_p4 = scmp.eq.s32.totalorder %s1317_s16, 0 }
   0xb   : > { %s1333_s21 = scalar_select %p25_p1, %s1260_s14, %s27_s19  }
   0xc   : > { %p1335_p5 = por %p35_p2, %p34_p0  ;;  %p1341_p6 = por %p2438_p4, %p40_p3 }
   0xd   : > { %p106_p7 = scmp.eq.s32.totalorder %s1317_s16, 1  ;;  %p112_p8 = scmp.eq.s32.totalorder %s995_s17, 1 }
   0xe   : > { %s2525_s23 = scalar_select %p1341_p6, 1, 0 }
   0xf   : > { %p996_p9 = scmp.ge.s32.totalorder %s1264_s15, 1  ;;  %p119_p10 = scmp.lt.s32.totalorder %s1264_s15, 3 }
  0x10   : > { %p1348_p11 = por %p106_p7, %p34_p0  ;;  %p1352_p12 = por %p112_p8, %p40_p3 }
  0x11   : > { %p1356_p13 = pnand %p996_p9, %p119_p10  ;;  %s1266_s27 = smov [#allocation5]  }
  0x12   : > { %s2526_s24 = scalar_select %p1348_p11, 1, 0 }
  0x13   : > { %s2527_s25 = scalar_select %p1352_p12, 1, 0 }
  0x14   : > { %s2528_s26 = scalar_select %p1356_p13, 1, 0 }
  0x15   : > { %p1043_p2 = pneg %p1356_p13  ;;  %s132_s28 = sshll.u32 %s1266_s27, 4  ;;  %s133_s28 = int_to_ptr.vmem [resolvable:$true] %s132_s28 }
  0x16   : > { %p1060_p4 = scmp.lt.s32.totalorder %s1264_s15, 2  ;;  %p2529_p0 = scmp.eq.s32.totalorder %s1317_s16, 0 }
  0x17   : > { %s1267_s4 = smov [#allocation7]   ;;  %s1108_s8 = scalar_lea.hbm %s2435_s1, 128 }
  0x18   : > { %p1366_p7 = pnand %p1043_p2, %p2529_p0  ;;  %p1372_p3 = pnand %p1060_p4, %p1335_p5 }
  0x19   : > { %s143_s5 = sshll.u32 %s1267_s4, 4  ;;  %p1109_p8 = scmp.ne.s32.totalorder %s2435_s1, %s1108_s8  ;;  %s1376_s5 = int_to_ptr.vmem [resolvable:$true] %s143_s5 }
  0x1a   : > { %s2531_s30 = scalar_select %p1372_p3, 1, 0 }
  0x1b   : > { %p1110_p9 = pneg %p1366_p7  ;;  %p1115_p10 = scmp.lt.u32.totalorder %s1108_s8, %s2435_s1 }
  0x1d   : > { %p1111_p4 = pnand %p1110_p9, %p1109_p8 }
  0x1f   : > { %p1112_p5 = pneg %p1111_p4 }
  0x21   : > { %p1117_p2 = pnand %p1115_p10, %p1112_p5 }
  0x23   : > { %1120 = shalt.err (!%p1117_p2)
}
  0x24   : > { %s1121_s19 = scalar_lea.vmem %s133_s28, 128  ;;  %p1129_p11 = scmp.lt.s32.totalorder %s133_s28, %s133_s28 }
  0x25   : > { %p1122_p0 = scmp.ne.s32.totalorder %s133_s28, %s1121_s19  ;;  %p1130_p6 = scmp.lt.s32.totalorder %s1121_s19, %s1121_s19 }
  0x27   : > { %p1124_p1 = pnand %p1122_p0, %p1110_p9  ;;  %p1131_p13 = por %p1130_p6, %p1129_p11 }
  0x29   : > { %p1125_p12 = pneg %p1124_p1 }
  0x2b   : > { %p1132_p3 = pnand %p1131_p13, %p1125_p12 }
  0x2d   : > { %1135 = shalt.err (!%p1132_p3)
}
  0x2e   : > { %1046 = dma.hbm_to_vmem [thread:$0]  (!%p1366_p7), %s2435_s1, 128, %s133_s28, [#allocation6]  }
  0x2f   : > { %s154_s27 = sand.u32 1, %s1260_s14   ;;  %s1136_s7 = scalar_lea.hbm %s2436_s2, 128 }
  0x30   : > { %p1137_p1 = scmp.ne.s32.totalorder %s2436_s2, %s1136_s7  ;;  %p1143_p12 = scmp.lt.u32.totalorder %s1136_s7, %s2436_s2 }
  0x32   : > { %p1139_p6 = pnand %p1137_p1, %p1110_p9 }
  0x34   : > { %p1140_p11 = pneg %p1139_p6 }
  0x36   : > { %p1145_p13 = pnand %p1143_p12, %p1140_p11 }
  0x38   : > { %1148 = shalt.err (!%p1145_p13)
}
  0x39   : > { %s1149_s28 = scalar_lea.vmem %s1376_s5, 128  ;;  %p1157_p5 = scmp.lt.s32.totalorder %s1376_s5, %s1376_s5 }
  0x3a   : > { %p1150_p3 = scmp.ne.s32.totalorder %s1376_s5, %s1149_s28  ;;  %p1158_p10 = scmp.lt.s32.totalorder %s1149_s28, %s1149_s28 }
  0x3c   : > { %p1152_p8 = pnand %p1150_p3, %p1110_p9  ;;  %p1159_p2 = por %p1158_p10, %p1157_p5 }
  0x3e   : > { %p1153_p4 = pneg %p1152_p8 }
  0x40   : > { %p1160_p0 = pnand %p1159_p2, %p1153_p4 }
  0x42   : > { %1163 = shalt.err (!%p1160_p0)
}
  0x43   : > { %1049 = dma.hbm_to_vmem [thread:$0]  (!%p1366_p7), %s2436_s2, 128, %s1376_s5, [#allocation6]  }
  0x44   : > { %s1000_s20 = sshll.u32 %s154_s27, 10  ;;  %s1015_s22 = sshll.u32 %s1264_s15, 14 }
  0x45   : > { %s1430_s7 = scalar_lea.hbm %s2434_s0, %s1015_s22  ;;  %s158_s29 = scalar_lea.vmem [#allocation2], %s1000_s20 }
  0x46   : > { %s165_s8 = sshll.u32 %s158_s29, 4  ;;  %s1434_s9 = scalar_lea.sflag [#allocation3], %s154_s27  ;;  %s1432_s8 = int_to_ptr.vmem [resolvable:$true] %s165_s8 }
  0x47   : > { %s1164_s10 = scalar_lea.hbm %s1430_s7, 16384  ;;  %p2532_p7 = scmp.ne.s32.totalorder %s2531_s30, 0 }
  0x48   : > { %p1165_p9 = scmp.ne.s32.totalorder %s1430_s7, %s1164_s10  ;;  %s1169_s28 = scalar_lea.hbm %s2434_s0, 32768 }
  0x49   : > { %p1166_p1 = pneg %p2532_p7  ;;  %p1170_p12 = scmp.lt.u32.totalorder %s1430_s7, %s2434_s0 }
  0x4a   : > { %p1171_p13 = scmp.lt.u32.totalorder %s1169_s28, %s1164_s10  ;;  %p1173_p8 = scmp.lt.u32.totalorder %s1164_s10, %s1430_s7 }
  0x4b   : > { %p1167_p6 = pnand %p1166_p1, %p1165_p9 }
  0x4c   : > { %p1172_p3 = por %p1171_p13, %p1170_p12 }
  0x4d   : > { %p1168_p11 = pneg %p1167_p6 }
  0x4e   : > { %p1174_p4 = por %p1173_p8, %p1172_p3 }
  0x50   : > { %p1175_p5 = pnand %p1174_p4, %p1168_p11 }
  0x52   : > { %1178 = shalt.err (!%p1175_p5)
}
  0x53   : > { %s1179_s27 = scalar_lea.vmem %s1432_s8, 16384  ;;  %s1268_s20 = smov [#allocation2]  }
  0x54   : > { %p1180_p10 = scmp.ne.s32.totalorder %s1432_s8, %s1179_s27  ;;  %s1184_s22 = sshll.u32 %s1268_s20, 4  ;;  %s1185_s22 = int_to_ptr.vmem [resolvable:$false] %s1184_s22 }
  0x55   : > { %s1186_s4 = scalar_lea.vmem %s1185_s22, 32768  ;;  %p1187_p9 = scmp.lt.s32.totalorder %s1432_s8, %s1185_s22 }
  0x56   : > { %p1182_p2 = pnand %p1180_p10, %p1166_p1  ;;  %p1188_p6 = scmp.lt.s32.totalorder %s1186_s4, %s1179_s27 }
  0x58   : > { %p1183_p0 = pneg %p1182_p2  ;;  %p1189_p12 = por %p1188_p6, %p1187_p9 }
  0x5a   : > { %p1190_p13 = pnand %p1189_p12, %p1183_p0 }
  0x5c   : > { %1193 = shalt.err (!%p1190_p13)
}
  0x5d   : > { %s1269_s6 = smov 128   ;;  %s1270_s29 = smov 8  }
  0x5e   : > { %1053 = dma.hbm_to_vmem [thread:$0]  (!%p2532_p7), %s1430_s7, 16384, %s1432_s8, %s1434_s9, %s1269_s6, %s1269_s6, %s1270_s29  }
  0x5f   : > { %p2533_p1 = scmp.ne.s32.totalorder %s2528_s26, 0 }
  0x61   : > { %177 = sbr.rel (%p2533_p1) target bundleno = 916 (0x394), region = 32 }
  0x68   : > { %s1465_s10 = sand.u32 1, %s1256_s13   ;;  %p2534_p11 = scmp.ne.s32.totalorder %s2525_s23, 0 }
  0x69   : > { %s1004_s5 = sshll.u32 %s1465_s10, 10  ;;  %s180_s11 = scalar_lea.sflag [#allocation3], %s1465_s10 }
  0x6a   : > { %s1471_s28 = scalar_lea.vmem [#allocation2], %s1004_s5 }
  0x6b   : > { %1239 = dma.done.wait (%p2534_p11), %s180_s11, 16384  }
  0x6c   : > { %1241 = vsyncadd (%p2534_p11), %s180_s11, 4294950912  ;;  %p2535_p7 = scmp.eq.s32.totalorder %s1317_s16, 0 }
  0x6e   : > { %1243 = dma.done.wait (%p2535_p7), [#allocation6], 256   ;;  %p2536_p3 = pmov %p2535_p7 }
  0x6f   : > { %v1271_v0 = vmov 0.0   ;;  %vm1272_vm0 = vmmov 0   ;;  %v476_v1 = vld [vmem:[#allocation5] sm:$0xff]  ;;  %v1485_v3 = vld [vmem:[%s1471_s28 + $0x8] sm:$0xff]  ;;  %v1488_v4 = vld [vmem:[%s1471_s28 + $0x10] sm:$0xff]  ;;  %vm549_vm1 = vcmask 64512  }
  0x70   : > { %1245 = vsyncadd (%p2536_p3), [#allocation6], 4294967040  ;;  %1021 = vmatprep.subr.mxu0 %v1271_v0  ;;  %1023 = vmatprep.mubr.msk.f32.mxu0 %vm1272_vm0, %v1271_v0  ;;  %v1482_v2 = vld [vmem:[%s1471_s28] sm:$0xff]  ;;  %v1493_v6 = vld [vmem:[%s1471_s28 + $0x18] sm:$0xff]  ;;  %s2021_s23 = scalar_lea.vmem [#allocation8], %s1004_s5  ;;  %s1016_s26 = sshll.u32 %s1317_s16, 14 }
  0x71   : > { %1026 = vmatprep.subr.mxu1 %v1271_v0  ;;  %1028 = vmatprep.mubr.msk.f32.mxu1 %vm1272_vm0, %v1271_v0  ;;  %v342_v5 = vadd.f32 %v1485_v3, %v1482_v2  ;;  %v1497_v8 = vld [vmem:[%s1471_s28 + $0x20] sm:$0xff]  ;;  %v1501_v10 = vld [vmem:[%s1471_s28 + $0x28] sm:$0xff]  ;;  %v1505_v12 = vld [vmem:[%s1471_s28 + $0x30] sm:$0xff]  ;;  %s903_s30 = sshll.u32 %s2021_s23, 4  ;;  %s2368_s8 = scalar_lea.hbm %s2437_s3, %s1016_s26  ;;  %s2370_s30 = int_to_ptr.vmem [resolvable:$true] %s903_s30 }
  0x72   : > { %1022 = vmatpush3.xpose.msra.mxu0 %v476_v1  ;;  %v1509_v14 = vld [vmem:[%s1471_s28 + $0x38] sm:$0xff]  ;;  %v1513_v16 = vld [vmem:[%s1471_s28 + $0x40] sm:$0xff]  ;;  %v1517_v18 = vld [vmem:[%s1471_s28 + $0x48] sm:$0xff]  ;;  %s890_s9 = scalar_lea.sflag [#allocation4], %s1465_s10  ;;  %s1194_s17 = scalar_lea.vmem %s2370_s30, 16384 }
  0x73   : > { %v343_v7 = vadd.f32 %v342_v5, %v1488_v4  ;;  %v1521_v20 = vld [vmem:[%s1471_s28 + $0x50] sm:$0xff]  ;;  %v1525_v22 = vld [vmem:[%s1471_s28 + $0x58] sm:$0xff]  ;;  %v1529_v24 = vld [vmem:[%s1471_s28 + $0x60] sm:$0xff]  ;;  %p1195_p8 = scmp.ne.s32.totalorder %s2370_s30, %s1194_s17  ;;  %p2699_p4 = scmp.ne.s32.totalorder %s2526_s24, 0 }
  0x74   : > { %v1533_v26 = vld [vmem:[%s1471_s28 + $0x68] sm:$0xff]  ;;  %v1537_v28 = vld [vmem:[%s1471_s28 + $0x70] sm:$0xff]  ;;  %v1541_v30 = vld [vmem:[%s1471_s28 + $0x78] sm:$0xff]  ;;  %s1273_s19 = smov [#allocation8]  }
  0x75   : > { %v344_v9 = vadd.f32 %v343_v7, %v1493_v6  ;;  %v1545_v32 = vld [vmem:[%s1471_s28 + $0x80] sm:$0xff]  ;;  %v1549_v34 = vld [vmem:[%s1471_s28 + $0x88] sm:$0xff]  ;;  %v1553_v36 = vld [vmem:[%s1471_s28 + $0x90] sm:$0xff]  ;;  %p1196_p5 = pnand %p1195_p8, %p2699_p4  ;;  %s1198_s27 = sshll.u32 %s1273_s19, 4  ;;  %s1199_s27 = int_to_ptr.vmem [resolvable:$false] %s1198_s27 }
  0x76   : > { %v1557_v38 = vld [vmem:[%s1471_s28 + $0x98] sm:$0xff]  ;;  %v1561_v40 = vld [vmem:[%s1471_s28 + $0xa0] sm:$0xff]  ;;  %v1565_v42 = vld [vmem:[%s1471_s28 + $0xa8] sm:$0xff]  ;;  %s1200_s20 = scalar_lea.vmem %s1199_s27, 32768  ;;  %p1201_p2 = scmp.lt.s32.totalorder %s2370_s30, %s1199_s27 }
  0x77   : > { %v345_v11 = vadd.f32 %v344_v9, %v1497_v8  ;;  %v1569_v44 = vld [vmem:[%s1471_s28 + $0xb0] sm:$0xff]  ;;  %v1573_v46 = vld [vmem:[%s1471_s28 + $0xb8] sm:$0xff]  ;;  %v1577_v48 = vld [vmem:[%s1471_s28 + $0xc0] sm:$0xff]  ;;  %p1197_p10 = pneg %p1196_p5  ;;  %p1202_p0 = scmp.lt.s32.totalorder %s1200_s20, %s1194_s17 }
  0x78   : > { %v1581_v50 = vld [vmem:[%s1471_s28 + $0xc8] sm:$0xff]  ;;  %v1585_v52 = vld [vmem:[%s1471_s28 + $0xd0] sm:$0xff]  ;;  %v1589_v54 = vld [vmem:[%s1471_s28 + $0xd8] sm:$0xff] }
  0x79   : > { %v346_v13 = vadd.f32 %v345_v11, %v1501_v10  ;;  %v1593_v56 = vld [vmem:[%s1471_s28 + $0xe0] sm:$0xff]  ;;  %v1597_v58 = vld [vmem:[%s1471_s28 + $0xe8] sm:$0xff]  ;;  %v1601_v60 = vld [vmem:[%s1471_s28 + $0xf0] sm:$0xff]  ;;  %p1203_p9 = por %p1202_p0, %p1201_p2 }
  0x7a   : > { %v1605_v62 = vld [vmem:[%s1471_s28 + $0xf8] sm:$0xff]  ;;  %v1609_v0 = vld [vmem:[%s1471_s28 + $0x100] sm:$0xff]  ;;  %v1613_v5 = vld [vmem:[%s1471_s28 + $0x108] sm:$0xff] }
  0x7b   : > { %v347_v15 = vadd.f32 %v346_v13, %v1505_v12  ;;  %v1617_v9 = vld [vmem:[%s1471_s28 + $0x110] sm:$0xff]  ;;  %v1621_v13 = vld [vmem:[%s1471_s28 + $0x118] sm:$0xff]  ;;  %p1204_p6 = pnand %p1203_p9, %p1197_p10 }
  0x7d   : > { %v348_v17 = vadd.f32 %v347_v15, %v1509_v14 }
  0x7f   : > { %v349_v19 = vadd.f32 %v348_v17, %v1513_v16  ;;  %v1625_v17 = vld [vmem:[%s1471_s28 + $0x120] sm:$0xff] }
  0x81   : > { %v350_v21 = vadd.f32 %v349_v19, %v1517_v18 }
  0x83   : > { %v351_v23 = vadd.f32 %v350_v21, %v1521_v20  ;;  %v1629_v21 = vld [vmem:[%s1471_s28 + $0x128] sm:$0xff] }
  0x85   : > { %v352_v25 = vadd.f32 %v351_v23, %v1525_v22 }
  0x87   : > { %v353_v27 = vadd.f32 %v352_v25, %v1529_v24  ;;  %v1633_v25 = vld [vmem:[%s1471_s28 + $0x130] sm:$0xff] }
  0x89   : > { %v354_v29 = vadd.f32 %v353_v27, %v1533_v26 }
  0x8b   : > { %v355_v31 = vadd.f32 %v354_v29, %v1537_v28  ;;  %v1637_v29 = vld [vmem:[%s1471_s28 + $0x138] sm:$0xff] }
  0x8d   : > { %v356_v33 = vadd.f32 %v355_v31, %v1541_v30 }
  0x8f   : > { %v357_v35 = vadd.f32 %v356_v33, %v1545_v32  ;;  %v1641_v33 = vld [vmem:[%s1471_s28 + $0x140] sm:$0xff] }
  0x91   : > { %v358_v37 = vadd.f32 %v357_v35, %v1549_v34 }
  0x93   : > { %v359_v39 = vadd.f32 %v358_v37, %v1553_v36  ;;  %v1645_v37 = vld [vmem:[%s1471_s28 + $0x148] sm:$0xff] }
  0x95   : > { %v360_v41 = vadd.f32 %v359_v39, %v1557_v38 }
  0x97   : > { %v361_v43 = vadd.f32 %v360_v41, %v1561_v40  ;;  %v1649_v41 = vld [vmem:[%s1471_s28 + $0x150] sm:$0xff] }
  0x99   : > { %v362_v45 = vadd.f32 %v361_v43, %v1565_v42 }
  0x9b   : > { %v363_v47 = vadd.f32 %v362_v45, %v1569_v44  ;;  %v1653_v45 = vld [vmem:[%s1471_s28 + $0x158] sm:$0xff] }
  0x9d   : > { %v364_v49 = vadd.f32 %v363_v47, %v1573_v46 }
  0x9f   : > { %v365_v51 = vadd.f32 %v364_v49, %v1577_v48  ;;  %v1657_v49 = vld [vmem:[%s1471_s28 + $0x160] sm:$0xff] }
  0xa1   : > { %v366_v53 = vadd.f32 %v365_v51, %v1581_v50 }
  0xa3   : > { %v367_v55 = vadd.f32 %v366_v53, %v1585_v52  ;;  %v1661_v53 = vld [vmem:[%s1471_s28 + $0x168] sm:$0xff] }
  0xa5   : > { %v368_v57 = vadd.f32 %v367_v55, %v1589_v54 }
  0xa7   : > { %v369_v59 = vadd.f32 %v368_v57, %v1593_v56  ;;  %v1665_v57 = vld [vmem:[%s1471_s28 + $0x170] sm:$0xff] }
  0xa8   : > { %2537 = vst [vmem:[#allocation12_spill] sm:$0xff] %v1665_v57 }
  0xa9   : > { %v370_v61 = vadd.f32 %v369_v59, %v1597_v58 }
  0xab   : > { %v371_v63 = vadd.f32 %v370_v61, %v1601_v60  ;;  %v1669_v61 = vld [vmem:[%s1471_s28 + $0x178] sm:$0xff] }
  0xac   : > { %2538 = vst [vmem:[#allocation13_spill] sm:$0xff] %v1669_v61 }
  0xad   : > { %v372_v1 = vadd.f32 %v371_v63, %v1605_v62 }
  0xaf   : > { %v373_v7 = vadd.f32 %v372_v1, %v1609_v0  ;;  %v1673_v1 = vld [vmem:[%s1471_s28 + $0x180] sm:$0xff] }
  0xb0   : > { %2539 = vst [vmem:[#allocation14_spill] sm:$0xff] %v1673_v1 }
  0xb1   : > { %v374_v11 = vadd.f32 %v373_v7, %v1613_v5 }
  0xb3   : > { %v375_v15 = vadd.f32 %v374_v11, %v1617_v9  ;;  %v1677_v11 = vld [vmem:[%s1471_s28 + $0x188] sm:$0xff] }
  0xb4   : > { %2540 = vst [vmem:[#allocation15_spill] sm:$0xff] %v1677_v11 }
  0xb5   : > { %v376_v19 = vadd.f32 %v375_v15, %v1621_v13 }
  0xb7   : > { %v377_v23 = vadd.f32 %v376_v19, %v1625_v17  ;;  %v1681_v19 = vld [vmem:[%s1471_s28 + $0x190] sm:$0xff] }
  0xb8   : > { %2541 = vst [vmem:[#allocation16_spill] sm:$0xff] %v1681_v19 }
  0xb9   : > { %v378_v27 = vadd.f32 %v377_v23, %v1629_v21 }
  0xbb   : > { %v379_v31 = vadd.f32 %v378_v27, %v1633_v25  ;;  %v1685_v27 = vld [vmem:[%s1471_s28 + $0x198] sm:$0xff] }
  0xbc   : > { %2542 = vst [vmem:[#allocation17_spill] sm:$0xff] %v1685_v27 }
  0xbd   : > { %v380_v35 = vadd.f32 %v379_v31, %v1637_v29 }
  0xbf   : > { %v381_v39 = vadd.f32 %v380_v35, %v1641_v33  ;;  %v1689_v35 = vld [vmem:[%s1471_s28 + $0x1a0] sm:$0xff] }
  0xc0   : > { %2543 = vst [vmem:[#allocation18_spill] sm:$0xff] %v1689_v35 }
  0xc1   : > { %v382_v43 = vadd.f32 %v381_v39, %v1645_v37 }
  0xc3   : > { %v383_v47 = vadd.f32 %v382_v43, %v1649_v41  ;;  %v1693_v43 = vld [vmem:[%s1471_s28 + $0x1a8] sm:$0xff] }
  0xc4   : > { %2544 = vst [vmem:[#allocation19_spill] sm:$0xff] %v1693_v43 }
  0xc5   : > { %v384_v51 = vadd.f32 %v383_v47, %v1653_v45 }
  0xc7   : > { %v385_v55 = vadd.f32 %v384_v51, %v1657_v49  ;;  %v1697_v51 = vld [vmem:[%s1471_s28 + $0x1b0] sm:$0xff] }
  0xc8   : > { %2545 = vst [vmem:[#allocation20_spill] sm:$0xff] %v1697_v51 }
  0xc9   : > { %v386_v59 = vadd.f32 %v385_v55, %v1661_v53 }
  0xcb   : > { %v387_v63 = vadd.f32 %v386_v59, %v1665_v57  ;;  %v1701_v59 = vld [vmem:[%s1471_s28 + $0x1b8] sm:$0xff] }
  0xcc   : > { %2546 = vst [vmem:[#allocation21_spill] sm:$0xff] %v1701_v59 }
  0xcd   : > { %v388_v7 = vadd.f32 %v387_v63, %v1669_v61  ;;  %v548_v61 = vld [vmem:[#allocation7] sm:$0xff] }
  0xce   : > { %1027 = vmatpush3.msra.mxu1 %v548_v61 }
  0xcf   : > { %v389_v15 = vadd.f32 %v388_v7, %v1673_v1  ;;  %v1705_v7 = vld [vmem:[%s1471_s28 + $0x1c0] sm:$0xff] }
  0xd0   : > { %2547 = vst [vmem:[#allocation22_spill] sm:$0xff] %v1705_v7 }
  0xd1   : > { %v390_v23 = vadd.f32 %v389_v15, %v1677_v11 }
  0xd3   : > { %v391_v31 = vadd.f32 %v390_v23, %v1681_v19  ;;  %v1709_v23 = vld [vmem:[%s1471_s28 + $0x1c8] sm:$0xff] }
  0xd4   : > { %2548 = vst [vmem:[#allocation23_spill] sm:$0xff] %v1709_v23 }
  0xd5   : > { %v392_v39 = vadd.f32 %v391_v31, %v1685_v27  ;;  %v1969_v27 = vld [vmem:[%s1471_s28 + $0x3d0] sm:$0xff] }
  0xd6   : > { %2613 = vst [vmem:[#allocation88_spill] sm:$0xff] %v1969_v27 }
  0xd7   : > { %v393_v47 = vadd.f32 %v392_v39, %v1689_v35  ;;  %v1713_v39 = vld [vmem:[%s1471_s28 + $0x1d0] sm:$0xff] }
  0xd8   : > { %2549 = vst [vmem:[#allocation24_spill] sm:$0xff] %v1713_v39 }
  0xd9   : > { %v394_v55 = vadd.f32 %v393_v47, %v1693_v43  ;;  %v1717_v43 = vld [vmem:[%s1471_s28 + $0x1d8] sm:$0xff] }
  0xda   : > { %2550 = vst [vmem:[#allocation25_spill] sm:$0xff] %v1717_v43 }
  0xdb   : > { %v395_v63 = vadd.f32 %v394_v55, %v1697_v51  ;;  %v1721_v51 = vld [vmem:[%s1471_s28 + $0x1e0] sm:$0xff] }
  0xdc   : > { %2551 = vst [vmem:[#allocation26_spill] sm:$0xff] %v1721_v51 }
  0xdd   : > { %v396_v15 = vadd.f32 %v395_v63, %v1701_v59  ;;  %v1725_v59 = vld [vmem:[%s1471_s28 + $0x1e8] sm:$0xff] }
  0xde   : > { %2552 = vst [vmem:[#allocation27_spill] sm:$0xff] %v1725_v59 }
  0xdf   : > { %v397_v31 = vadd.f32 %v396_v15, %v1705_v7  ;;  %v1729_v7 = vld [vmem:[%s1471_s28 + $0x1f0] sm:$0xff] }
  0xe0   : > { %2553 = vst [vmem:[#allocation28_spill] sm:$0xff] %v1729_v7 }
  0xe1   : > { %v398_v47 = vadd.f32 %v397_v31, %v1709_v23  ;;  %v1733_v23 = vld [vmem:[%s1471_s28 + $0x1f8] sm:$0xff] }
  0xe2   : > { %2554 = vst [vmem:[#allocation29_spill] sm:$0xff] %v1733_v23 }
  0xe3   : > { %v399_v55 = vadd.f32 %v398_v47, %v1713_v39  ;;  %v1737_v39 = vld [vmem:[%s1471_s28 + $0x200] sm:$0xff] }
  0xe4   : > { %2555 = vst [vmem:[#allocation30_spill] sm:$0xff] %v1737_v39 }
  0xe5   : > { %v400_v63 = vadd.f32 %v399_v55, %v1717_v43  ;;  %v1741_v43 = vld [vmem:[%s1471_s28 + $0x208] sm:$0xff] }
  0xe6   : > { %2556 = vst [vmem:[#allocation31_spill] sm:$0xff] %v1741_v43 }
  0xe7   : > { %v401_v15 = vadd.f32 %v400_v63, %v1721_v51  ;;  %v1745_v51 = vld [vmem:[%s1471_s28 + $0x210] sm:$0xff] }
  0xe8   : > { %2557 = vst [vmem:[#allocation32_spill] sm:$0xff] %v1745_v51 }
  0xe9   : > { %v402_v31 = vadd.f32 %v401_v15, %v1725_v59  ;;  %v1749_v59 = vld [vmem:[%s1471_s28 + $0x218] sm:$0xff] }
  0xea   : > { %2558 = vst [vmem:[#allocation33_spill] sm:$0xff] %v1749_v59 }
  0xeb   : > { %v403_v47 = vadd.f32 %v402_v31, %v1729_v7  ;;  %v1753_v7 = vld [vmem:[%s1471_s28 + $0x220] sm:$0xff] }
  0xec   : > { %2559 = vst [vmem:[#allocation34_spill] sm:$0xff] %v1753_v7 }
  0xed   : > { %v404_v55 = vadd.f32 %v403_v47, %v1733_v23  ;;  %v1757_v23 = vld [vmem:[%s1471_s28 + $0x228] sm:$0xff] }
  0xee   : > { %2560 = vst [vmem:[#allocation35_spill] sm:$0xff] %v1757_v23 }
  0xef   : > { %v405_v63 = vadd.f32 %v404_v55, %v1737_v39  ;;  %v1761_v39 = vld [vmem:[%s1471_s28 + $0x230] sm:$0xff] }
  0xf0   : > { %2561 = vst [vmem:[#allocation36_spill] sm:$0xff] %v1761_v39 }
  0xf1   : > { %v406_v15 = vadd.f32 %v405_v63, %v1741_v43  ;;  %v1765_v43 = vld [vmem:[%s1471_s28 + $0x238] sm:$0xff] }
  0xf2   : > { %2562 = vst [vmem:[#allocation37_spill] sm:$0xff] %v1765_v43 }
  0xf3   : > { %v407_v31 = vadd.f32 %v406_v15, %v1745_v51  ;;  %v1769_v51 = vld [vmem:[%s1471_s28 + $0x240] sm:$0xff] }
  0xf4   : > { %2563 = vst [vmem:[#allocation38_spill] sm:$0xff] %v1769_v51 }
  0xf5   : > { %v408_v47 = vadd.f32 %v407_v31, %v1749_v59  ;;  %v1773_v59 = vld [vmem:[%s1471_s28 + $0x248] sm:$0xff] }
  0xf6   : > { %2564 = vst [vmem:[#allocation39_spill] sm:$0xff] %v1773_v59 }
  0xf7   : > { %v409_v55 = vadd.f32 %v408_v47, %v1753_v7  ;;  %v1777_v7 = vld [vmem:[%s1471_s28 + $0x250] sm:$0xff] }
  0xf8   : > { %2565 = vst [vmem:[#allocation40_spill] sm:$0xff] %v1777_v7 }
  0xf9   : > { %v410_v63 = vadd.f32 %v409_v55, %v1757_v23  ;;  %v1781_v23 = vld [vmem:[%s1471_s28 + $0x258] sm:$0xff] }
  0xfa   : > { %2566 = vst [vmem:[#allocation41_spill] sm:$0xff] %v1781_v23 }
  0xfb   : > { %v411_v15 = vadd.f32 %v410_v63, %v1761_v39  ;;  %v1785_v39 = vld [vmem:[%s1471_s28 + $0x260] sm:$0xff] }
  0xfc   : > { %2567 = vst [vmem:[#allocation42_spill] sm:$0xff] %v1785_v39 }
  0xfd   : > { %v412_v31 = vadd.f32 %v411_v15, %v1765_v43  ;;  %v1789_v43 = vld [vmem:[%s1471_s28 + $0x268] sm:$0xff] }
  0xfe   : > { %2568 = vst [vmem:[#allocation43_spill] sm:$0xff] %v1789_v43 }
  0xff   : > { %v413_v47 = vadd.f32 %v412_v31, %v1769_v51  ;;  %v1793_v51 = vld [vmem:[%s1471_s28 + $0x270] sm:$0xff] }
 0x100   : > { %2569 = vst [vmem:[#allocation44_spill] sm:$0xff] %v1793_v51 }
 0x101   : > { %v414_v55 = vadd.f32 %v413_v47, %v1773_v59  ;;  %v1797_v59 = vld [vmem:[%s1471_s28 + $0x278] sm:$0xff] }
 0x102   : > { %2570 = vst [vmem:[#allocation45_spill] sm:$0xff] %v1797_v59 }
 0x103   : > { %v415_v63 = vadd.f32 %v414_v55, %v1777_v7  ;;  %v1801_v7 = vld [vmem:[%s1471_s28 + $0x280] sm:$0xff] }
 0x104   : > { %2571 = vst [vmem:[#allocation46_spill] sm:$0xff] %v1801_v7 }
 0x105   : > { %v416_v15 = vadd.f32 %v415_v63, %v1781_v23  ;;  %v1805_v23 = vld [vmem:[%s1471_s28 + $0x288] sm:$0xff] }
 0x106   : > { %2572 = vst [vmem:[#allocation47_spill] sm:$0xff] %v1805_v23 }
 0x107   : > { %v417_v31 = vadd.f32 %v416_v15, %v1785_v39  ;;  %v1809_v39 = vld [vmem:[%s1471_s28 + $0x290] sm:$0xff] }
 0x108   : > { %2573 = vst [vmem:[#allocation48_spill] sm:$0xff] %v1809_v39 }
 0x109   : > { %v418_v47 = vadd.f32 %v417_v31, %v1789_v43  ;;  %v1813_v43 = vld [vmem:[%s1471_s28 + $0x298] sm:$0xff] }
 0x10a   : > { %2574 = vst [vmem:[#allocation49_spill] sm:$0xff] %v1813_v43 }
 0x10b   : > { %v419_v55 = vadd.f32 %v418_v47, %v1793_v51  ;;  %v1817_v51 = vld [vmem:[%s1471_s28 + $0x2a0] sm:$0xff] }
 0x10c   : > { %2575 = vst [vmem:[#allocation50_spill] sm:$0xff] %v1817_v51 }
 0x10d   : > { %v420_v63 = vadd.f32 %v419_v55, %v1797_v59  ;;  %v1821_v59 = vld [vmem:[%s1471_s28 + $0x2a8] sm:$0xff] }
 0x10e   : > { %2576 = vst [vmem:[#allocation51_spill] sm:$0xff] %v1821_v59 }
 0x10f   : > { %v421_v15 = vadd.f32 %v420_v63, %v1801_v7  ;;  %v1825_v7 = vld [vmem:[%s1471_s28 + $0x2b0] sm:$0xff] }
 0x110   : > { %2577 = vst [vmem:[#allocation52_spill] sm:$0xff] %v1825_v7 }
 0x111   : > { %v422_v31 = vadd.f32 %v421_v15, %v1805_v23  ;;  %v1829_v23 = vld [vmem:[%s1471_s28 + $0x2b8] sm:$0xff] }
 0x112   : > { %2578 = vst [vmem:[#allocation53_spill] sm:$0xff] %v1829_v23 }
 0x113   : > { %v423_v47 = vadd.f32 %v422_v31, %v1809_v39  ;;  %v1833_v39 = vld [vmem:[%s1471_s28 + $0x2c0] sm:$0xff] }
 0x114   : > { %2579 = vst [vmem:[#allocation54_spill] sm:$0xff] %v1833_v39 }
 0x115   : > { %v424_v55 = vadd.f32 %v423_v47, %v1813_v43  ;;  %v1837_v43 = vld [vmem:[%s1471_s28 + $0x2c8] sm:$0xff] }
 0x116   : > { %2580 = vst [vmem:[#allocation55_spill] sm:$0xff] %v1837_v43 }
 0x117   : > { %v425_v63 = vadd.f32 %v424_v55, %v1817_v51  ;;  %v1841_v51 = vld [vmem:[%s1471_s28 + $0x2d0] sm:$0xff] }
 0x118   : > { %2581 = vst [vmem:[#allocation56_spill] sm:$0xff] %v1841_v51 }
 0x119   : > { %v426_v15 = vadd.f32 %v425_v63, %v1821_v59  ;;  %v1845_v59 = vld [vmem:[%s1471_s28 + $0x2d8] sm:$0xff] }
 0x11a   : > { %2582 = vst [vmem:[#allocation57_spill] sm:$0xff] %v1845_v59 }
 0x11b   : > { %v427_v31 = vadd.f32 %v426_v15, %v1825_v7  ;;  %v1849_v7 = vld [vmem:[%s1471_s28 + $0x2e0] sm:$0xff] }
 0x11c   : > { %2583 = vst [vmem:[#allocation58_spill] sm:$0xff] %v1849_v7 }
 0x11d   : > { %v428_v47 = vadd.f32 %v427_v31, %v1829_v23  ;;  %v1853_v23 = vld [vmem:[%s1471_s28 + $0x2e8] sm:$0xff] }
 0x11e   : > { %2584 = vst [vmem:[#allocation59_spill] sm:$0xff] %v1853_v23 }
 0x11f   : > { %v429_v55 = vadd.f32 %v428_v47, %v1833_v39  ;;  %v1857_v39 = vld [vmem:[%s1471_s28 + $0x2f0] sm:$0xff] }
 0x120   : > { %2585 = vst [vmem:[#allocation60_spill] sm:$0xff] %v1857_v39 }
 0x121   : > { %v430_v63 = vadd.f32 %v429_v55, %v1837_v43  ;;  %v1861_v43 = vld [vmem:[%s1471_s28 + $0x2f8] sm:$0xff] }
 0x122   : > { %2586 = vst [vmem:[#allocation61_spill] sm:$0xff] %v1861_v43 }
 0x123   : > { %v431_v15 = vadd.f32 %v430_v63, %v1841_v51  ;;  %v1865_v51 = vld [vmem:[%s1471_s28 + $0x300] sm:$0xff] }
 0x124   : > { %2587 = vst [vmem:[#allocation62_spill] sm:$0xff] %v1865_v51 }
 0x125   : > { %v432_v31 = vadd.f32 %v431_v15, %v1845_v59  ;;  %v1869_v59 = vld [vmem:[%s1471_s28 + $0x308] sm:$0xff] }
 0x126   : > { %2588 = vst [vmem:[#allocation63_spill] sm:$0xff] %v1869_v59 }
 0x127   : > { %v433_v47 = vadd.f32 %v432_v31, %v1849_v7  ;;  %v1873_v7 = vld [vmem:[%s1471_s28 + $0x310] sm:$0xff] }
 0x128   : > { %2589 = vst [vmem:[#allocation64_spill] sm:$0xff] %v1873_v7 }
 0x129   : > { %v434_v55 = vadd.f32 %v433_v47, %v1853_v23  ;;  %v1877_v23 = vld [vmem:[%s1471_s28 + $0x318] sm:$0xff] }
 0x12a   : > { %2590 = vst [vmem:[#allocation65_spill] sm:$0xff] %v1877_v23 }
 0x12b   : > { %v435_v63 = vadd.f32 %v434_v55, %v1857_v39  ;;  %v1881_v39 = vld [vmem:[%s1471_s28 + $0x320] sm:$0xff] }
 0x12c   : > { %2591 = vst [vmem:[#allocation66_spill] sm:$0xff] %v1881_v39 }
 0x12d   : > { %v436_v15 = vadd.f32 %v435_v63, %v1861_v43  ;;  %v1885_v43 = vld [vmem:[%s1471_s28 + $0x328] sm:$0xff] }
 0x12e   : > { %2592 = vst [vmem:[#allocation67_spill] sm:$0xff] %v1885_v43 }
 0x12f   : > { %v437_v31 = vadd.f32 %v436_v15, %v1865_v51  ;;  %v1889_v51 = vld [vmem:[%s1471_s28 + $0x330] sm:$0xff] }
 0x130   : > { %2593 = vst [vmem:[#allocation68_spill] sm:$0xff] %v1889_v51 }
 0x131   : > { %v438_v47 = vadd.f32 %v437_v31, %v1869_v59  ;;  %v1893_v59 = vld [vmem:[%s1471_s28 + $0x338] sm:$0xff] }
 0x132   : > { %2594 = vst [vmem:[#allocation69_spill] sm:$0xff] %v1893_v59 }
 0x133   : > { %v439_v55 = vadd.f32 %v438_v47, %v1873_v7  ;;  %v1897_v7 = vld [vmem:[%s1471_s28 + $0x340] sm:$0xff] }
 0x134   : > { %2595 = vst [vmem:[#allocation70_spill] sm:$0xff] %v1897_v7 }
 0x135   : > { %v440_v63 = vadd.f32 %v439_v55, %v1877_v23  ;;  %v1901_v23 = vld [vmem:[%s1471_s28 + $0x348] sm:$0xff] }
 0x136   : > { %2596 = vst [vmem:[#allocation71_spill] sm:$0xff] %v1901_v23 }
 0x137   : > { %v441_v15 = vadd.f32 %v440_v63, %v1881_v39  ;;  %v1905_v39 = vld [vmem:[%s1471_s28 + $0x350] sm:$0xff] }
 0x138   : > { %2597 = vst [vmem:[#allocation72_spill] sm:$0xff] %v1905_v39 }
 0x139   : > { %v442_v31 = vadd.f32 %v441_v15, %v1885_v43  ;;  %v1909_v43 = vld [vmem:[%s1471_s28 + $0x358] sm:$0xff] }
 0x13a   : > { %2598 = vst [vmem:[#allocation73_spill] sm:$0xff] %v1909_v43 }
 0x13b   : > { %v443_v47 = vadd.f32 %v442_v31, %v1889_v51  ;;  %v1913_v51 = vld [vmem:[%s1471_s28 + $0x360] sm:$0xff] }
 0x13c   : > { %2599 = vst [vmem:[#allocation74_spill] sm:$0xff] %v1913_v51 }
 0x13d   : > { %v444_v55 = vadd.f32 %v443_v47, %v1893_v59  ;;  %v1917_v59 = vld [vmem:[%s1471_s28 + $0x368] sm:$0xff] }
 0x13e   : > { %2600 = vst [vmem:[#allocation75_spill] sm:$0xff] %v1917_v59 }
 0x13f   : > { %v445_v63 = vadd.f32 %v444_v55, %v1897_v7  ;;  %v1921_v7 = vld [vmem:[%s1471_s28 + $0x370] sm:$0xff] }
 0x140   : > { %2601 = vst [vmem:[#allocation76_spill] sm:$0xff] %v1921_v7 }
 0x141   : > { %v446_v15 = vadd.f32 %v445_v63, %v1901_v23  ;;  %v1925_v23 = vld [vmem:[%s1471_s28 + $0x378] sm:$0xff] }
 0x142   : > { %2602 = vst [vmem:[#allocation77_spill] sm:$0xff] %v1925_v23 }
 0x143   : > { %v447_v31 = vadd.f32 %v446_v15, %v1905_v39  ;;  %v1929_v39 = vld [vmem:[%s1471_s28 + $0x380] sm:$0xff] }
 0x144   : > { %2603 = vst [vmem:[#allocation78_spill] sm:$0xff] %v1929_v39 }
 0x145   : > { %v448_v47 = vadd.f32 %v447_v31, %v1909_v43  ;;  %v1933_v43 = vld [vmem:[%s1471_s28 + $0x388] sm:$0xff] }
 0x146   : > { %2604 = vst [vmem:[#allocation79_spill] sm:$0xff] %v1933_v43 }
 0x147   : > { %v449_v55 = vadd.f32 %v448_v47, %v1913_v51  ;;  %v1937_v51 = vld [vmem:[%s1471_s28 + $0x390] sm:$0xff] }
 0x148   : > { %2605 = vst [vmem:[#allocation80_spill] sm:$0xff] %v1937_v51 }
 0x149   : > { %v450_v63 = vadd.f32 %v449_v55, %v1917_v59  ;;  %v1941_v59 = vld [vmem:[%s1471_s28 + $0x398] sm:$0xff] }
 0x14a   : > { %2606 = vst [vmem:[#allocation81_spill] sm:$0xff] %v1941_v59 }
 0x14b   : > { %v451_v15 = vadd.f32 %v450_v63, %v1921_v7  ;;  %v1945_v7 = vld [vmem:[%s1471_s28 + $0x3a0] sm:$0xff] }
 0x14c   : > { %2607 = vst [vmem:[#allocation82_spill] sm:$0xff] %v1945_v7 }
 0x14d   : > { %v452_v31 = vadd.f32 %v451_v15, %v1925_v23  ;;  %v1949_v23 = vld [vmem:[%s1471_s28 + $0x3a8] sm:$0xff] }
 0x14e   : > { %2608 = vst [vmem:[#allocation83_spill] sm:$0xff] %v1949_v23 }
 0x14f   : > { %v453_v47 = vadd.f32 %v452_v31, %v1929_v39  ;;  %v1953_v39 = vld [vmem:[%s1471_s28 + $0x3b0] sm:$0xff] }
 0x150   : > { %2609 = vst [vmem:[#allocation84_spill] sm:$0xff] %v1953_v39 }
 0x151   : > { %v454_v55 = vadd.f32 %v453_v47, %v1933_v43  ;;  %v1957_v43 = vld [vmem:[%s1471_s28 + $0x3b8] sm:$0xff] }
 0x152   : > { %2610 = vst [vmem:[#allocation85_spill] sm:$0xff] %v1957_v43 }
 0x153   : > { %v455_v63 = vadd.f32 %v454_v55, %v1937_v51  ;;  %v1961_v51 = vld [vmem:[%s1471_s28 + $0x3c0] sm:$0xff] }
 0x154   : > { %2611 = vst [vmem:[#allocation86_spill] sm:$0xff] %v1961_v51 }
 0x155   : > { %v456_v15 = vadd.f32 %v455_v63, %v1941_v59  ;;  %v1965_v63 = vld [vmem:[%s1471_s28 + $0x3c8] sm:$0xff] }
 0x156   : > { %2612 = vst [vmem:[#allocation87_spill] sm:$0xff] %v1965_v63 }
 0x157   : > { %v457_v31 = vadd.f32 %v456_v15, %v1945_v7  ;;  %v1973_v7 = vld [vmem:[%s1471_s28 + $0x3d8] sm:$0xff] }
 0x158   : > { %2614 = vst [vmem:[#allocation89_spill] sm:$0xff] %v1973_v7 }
 0x159   : > { %v458_v47 = vadd.f32 %v457_v31, %v1949_v23  ;;  %v1977_v23 = vld [vmem:[%s1471_s28 + $0x3e0] sm:$0xff] }
 0x15a   : > { %2615 = vst [vmem:[#allocation90_spill] sm:$0xff] %v1977_v23 }
 0x15b   : > { %v459_v55 = vadd.f32 %v458_v47, %v1953_v39  ;;  %v1981_v39 = vld [vmem:[%s1471_s28 + $0x3e8] sm:$0xff] }
 0x15c   : > { %2616 = vst [vmem:[#allocation91_spill] sm:$0xff] %v1981_v39 }
 0x15d   : > { %v460_v35 = vadd.f32 %v459_v55, %v1957_v43  ;;  %v1985_v43 = vld [vmem:[%s1471_s28 + $0x3f0] sm:$0xff] }
 0x15f   : > { %v461_v59 = vadd.f32 %v460_v35, %v1961_v51  ;;  %v1989_v51 = vld [vmem:[%s1471_s28 + $0x3f8] sm:$0xff] }
 0x160   : > { %2617 = vst [vmem:[#allocation92_spill] sm:$0xff] %v1989_v51 }
 0x161   : > { %v462_v15 = vadd.f32 %v461_v59, %v1965_v63 }
 0x163   : > { %v463_v31 = vadd.f32 %v462_v15, %v1969_v27 }
 0x165   : > { %v464_v47 = vadd.f32 %v463_v31, %v1973_v7 }
 0x167   : > { %v465_v55 = vadd.f32 %v464_v47, %v1977_v23 }
 0x169   : > { %v466_v35 = vadd.f32 %v465_v55, %v1981_v39 }
 0x16b   : > { %v467_v59 = vadd.f32 %v466_v35, %v1985_v43 }
 0x16d   : > { %v468_v63 = vadd.f32 %v467_v59, %v1989_v51 }
 0x16f   : > { %v469_v19 = vrot.slane %v468_v63, 4 }
 0x171   : > { %v470_v15 = vadd.f32 %v469_v19, %v468_v63  ;;  %v629_v19 = vlaneseq }
 0x173   : > { %v471_v27 = vrot.slane %v470_v15, 2 }
 0x175   : > { %v472_v11 = vadd.f32 %v471_v27, %v470_v15  ;;  %v630_v27 = vshrl.u32 %v629_v19, 7  ;;  %v2624_v19 = vld [vmem:[#allocation18_spill] sm:$0xff] }
 0x177   : > { %v473_v1 = vrot.slane %v472_v11, 1 }
 0x179   : > { %v474_v31 = vadd.f32 %v473_v1, %v472_v11  ;;  %v631_v1 = vsub.s32 0, %v630_v27 }
 0x17b   : > { %v475_v7 = vmul.f32 0.0009765625, %v474_v31  ;;  %v2621_v31 = vld [vmem:[#allocation15_spill] sm:$0xff] }
 0x17d   : > { %1024 = vmatmul.mubr.f32.vlgmr.msra.gmra.mrb[0].mxu0 %v475_v7 }
 0x250   : > { %v543_v47 = vpop.f32.mrb[0].mxu0 }
 0x251   : > { %v547_v23 = vmax.f32 %v543_v47, 0.0  ;;  %v1025_v55 = vpop.f32.mrb[1].mxu0  ;;  %v2622_v47 = vld [vmem:[#allocation16_spill] sm:$0xff] }
 0x253   : > { %1029 = vmatmul.mubr.msk.f32.vlgmr.msra.gmra.mrb[0].mxu1 %vm549_vm1, %v547_v23 }
 0x326   : > { %v619_v39 = vpop.f32.mrb[0].mxu1 }
 0x327   : > { %v1009_v57 = vmul.f32 -1.442695, %v619_v39  ;;  %v1030_v35 = vpop.f32.mrb[1].mxu1 }
 0x328   : > { %v2623_v35 = vld [vmem:[#allocation17_spill] sm:$0xff] }
 0x329   : > { %1104 = vpow2.f32 %v1009_v57 }
 0x333   : > { %v1105_v59 = vpop.eup %1104 }
 0x334   : > { %v626_v51 = vadd.f32 1.0, %v1105_v59 }
 0x336   : > { %1106 = vrcp.f32 %v626_v51 }
 0x340   : > { %v1107_v11 = vpop.eup %1106 }
 0x341   : > { %v1993_v7 = vrot.slane %v1107_v11, %v631_v1  ;;  %v2625_v1 = vld [vmem:[#allocation19_spill] sm:$0xff] }
 0x343   : > { %v633_v61 = vmul.f32 %v1993_v7, %v1482_v2  ;;  %v634_v23 = vmul.f32 %v1993_v7, %v1485_v3  ;;  %v635_v39 = vmul.f32 %v1993_v7, %v1488_v4  ;;  %v636_v57 = vmul.f32 %v1993_v7, %v1493_v6 }
 0x344   : > { %v637_v51 = vmul.f32 %v1993_v7, %v1497_v8  ;;  %v638_v63 = vmul.f32 %v1993_v7, %v1501_v10  ;;  %v639_v15 = vmul.f32 %v1993_v7, %v1505_v12  ;;  %v640_v2 = vmul.f32 %v1993_v7, %v1509_v14 }
 0x345   : > { %v641_v3 = vmul.f32 %v1993_v7, %v1513_v16  ;;  %v642_v4 = vmul.f32 %v1993_v7, %v1517_v18  ;;  %v643_v6 = vmul.f32 %v1993_v7, %v1521_v20  ;;  %v644_v8 = vmul.f32 %v1993_v7, %v1525_v22  ;;  %761 = vst [vmem:[%s2021_s23] sm:$0xff] %v633_v61  ;;  %v2626_v61 = vld [vmem:[#allocation20_spill] sm:$0xff] }
 0x346   : > { %762 = vst [vmem:[%s2021_s23 + $0x8] sm:$0xff] %v634_v23  ;;  %763 = vst [vmem:[%s2021_s23 + $0x10] sm:$0xff] %v635_v39  ;;  %v645_v10 = vmul.f32 %v1993_v7, %v1529_v24  ;;  %v646_v12 = vmul.f32 %v1993_v7, %v1533_v26  ;;  %v647_v14 = vmul.f32 %v1993_v7, %v1537_v28  ;;  %v2627_v39 = vld [vmem:[#allocation21_spill] sm:$0xff] }
 0x347   : > { %764 = vst [vmem:[%s2021_s23 + $0x18] sm:$0xff] %v636_v57  ;;  %v648_v16 = vmul.f32 %v1993_v7, %v1541_v30  ;;  %765 = vst [vmem:[%s2021_s23 + $0x20] sm:$0xff] %v637_v51  ;;  %v649_v18 = vmul.f32 %v1993_v7, %v1545_v32  ;;  %v650_v20 = vmul.f32 %v1993_v7, %v1549_v34  ;;  %v2628_v51 = vld [vmem:[#allocation22_spill] sm:$0xff] }
 0x348   : > { %766 = vst [vmem:[%s2021_s23 + $0x28] sm:$0xff] %v638_v63  ;;  %767 = vst [vmem:[%s2021_s23 + $0x30] sm:$0xff] %v639_v15  ;;  %v651_v22 = vmul.f32 %v1993_v7, %v1553_v36  ;;  %v652_v24 = vmul.f32 %v1993_v7, %v1557_v38  ;;  %v653_v26 = vmul.f32 %v1993_v7, %v1561_v40  ;;  %v2629_v15 = vld [vmem:[#allocation23_spill] sm:$0xff] }
 0x349   : > { %768 = vst [vmem:[%s2021_s23 + $0x38] sm:$0xff] %v640_v2  ;;  %769 = vst [vmem:[%s2021_s23 + $0x40] sm:$0xff] %v641_v3  ;;  %v654_v28 = vmul.f32 %v1993_v7, %v1565_v42  ;;  %v655_v30 = vmul.f32 %v1993_v7, %v1569_v44  ;;  %v656_v32 = vmul.f32 %v1993_v7, %v1573_v46  ;;  %v2630_v3 = vld [vmem:[#allocation24_spill] sm:$0xff] }
 0x34a   : > { %770 = vst [vmem:[%s2021_s23 + $0x48] sm:$0xff] %v642_v4  ;;  %771 = vst [vmem:[%s2021_s23 + $0x50] sm:$0xff] %v643_v6  ;;  %v657_v34 = vmul.f32 %v1993_v7, %v1577_v48  ;;  %v658_v36 = vmul.f32 %v1993_v7, %v1581_v50  ;;  %v659_v38 = vmul.f32 %v1993_v7, %v1585_v52  ;;  %v2631_v6 = vld [vmem:[#allocation25_spill] sm:$0xff] }
 0x34b   : > { %772 = vst [vmem:[%s2021_s23 + $0x58] sm:$0xff] %v644_v8  ;;  %773 = vst [vmem:[%s2021_s23 + $0x60] sm:$0xff] %v645_v10  ;;  %v660_v40 = vmul.f32 %v1993_v7, %v1589_v54  ;;  %v661_v42 = vmul.f32 %v1993_v7, %v1593_v56  ;;  %v662_v44 = vmul.f32 %v1993_v7, %v1597_v58  ;;  %v2632_v10 = vld [vmem:[#allocation26_spill] sm:$0xff] }
 0x34c   : > { %774 = vst [vmem:[%s2021_s23 + $0x68] sm:$0xff] %v646_v12  ;;  %775 = vst [vmem:[%s2021_s23 + $0x70] sm:$0xff] %v647_v14  ;;  %v663_v46 = vmul.f32 %v1993_v7, %v1601_v60  ;;  %v664_v48 = vmul.f32 %v1993_v7, %v1605_v62  ;;  %v665_v50 = vmul.f32 %v1993_v7, %v1609_v0  ;;  %v2633_v14 = vld [vmem:[#allocation27_spill] sm:$0xff] }
 0x34d   : > { %776 = vst [vmem:[%s2021_s23 + $0x78] sm:$0xff] %v648_v16  ;;  %777 = vst [vmem:[%s2021_s23 + $0x80] sm:$0xff] %v649_v18  ;;  %v666_v52 = vmul.f32 %v1993_v7, %v1613_v5  ;;  %v667_v54 = vmul.f32 %v1993_v7, %v1617_v9  ;;  %v668_v56 = vmul.f32 %v1993_v7, %v1621_v13  ;;  %v2634_v18 = vld [vmem:[#allocation28_spill] sm:$0xff] }
 0x34e   : > { %778 = vst [vmem:[%s2021_s23 + $0x88] sm:$0xff] %v650_v20  ;;  %779 = vst [vmem:[%s2021_s23 + $0x90] sm:$0xff] %v651_v22  ;;  %v669_v58 = vmul.f32 %v1993_v7, %v1625_v17  ;;  %v670_v60 = vmul.f32 %v1993_v7, %v1629_v21  ;;  %v671_v62 = vmul.f32 %v1993_v7, %v1633_v25  ;;  %v2635_v22 = vld [vmem:[#allocation29_spill] sm:$0xff] }
 0x34f   : > { %780 = vst [vmem:[%s2021_s23 + $0x98] sm:$0xff] %v652_v24  ;;  %781 = vst [vmem:[%s2021_s23 + $0xa0] sm:$0xff] %v653_v26  ;;  %v672_v0 = vmul.f32 %v1993_v7, %v1637_v29  ;;  %v673_v5 = vmul.f32 %v1993_v7, %v1641_v33  ;;  %v674_v9 = vmul.f32 %v1993_v7, %v1645_v37  ;;  %v2618_v29 = vld [vmem:[#allocation12_spill] sm:$0xff]  ;;  %v2619_v37 = vld [vmem:[#allocation13_spill] sm:$0xff] }
 0x350   : > { %782 = vst [vmem:[%s2021_s23 + $0xa8] sm:$0xff] %v654_v28  ;;  %783 = vst [vmem:[%s2021_s23 + $0xb0] sm:$0xff] %v655_v30  ;;  %v675_v13 = vmul.f32 %v1993_v7, %v1649_v41  ;;  %v676_v17 = vmul.f32 %v1993_v7, %v1653_v45  ;;  %v677_v21 = vmul.f32 %v1993_v7, %v1657_v49  ;;  %v2620_v45 = vld [vmem:[#allocation14_spill] sm:$0xff]  ;;  %v2637_v30 = vld [vmem:[#allocation31_spill] sm:$0xff] }
 0x351   : > { %784 = vst [vmem:[%s2021_s23 + $0xb8] sm:$0xff] %v656_v32  ;;  %785 = vst [vmem:[%s2021_s23 + $0xc0] sm:$0xff] %v657_v34  ;;  %v678_v25 = vmul.f32 %v1993_v7, %v1661_v53  ;;  %v679_v33 = vmul.f32 %v1993_v7, %v2618_v29  ;;  %v680_v41 = vmul.f32 %v1993_v7, %v2619_v37  ;;  %v2636_v26 = vld [vmem:[#allocation30_spill] sm:$0xff]  ;;  %v2638_v34 = vld [vmem:[#allocation32_spill] sm:$0xff] }
 0x352   : > { %786 = vst [vmem:[%s2021_s23 + $0xc8] sm:$0xff] %v658_v36  ;;  %787 = vst [vmem:[%s2021_s23 + $0xd0] sm:$0xff] %v659_v38  ;;  %v681_v49 = vmul.f32 %v1993_v7, %v2620_v45  ;;  %v682_v53 = vmul.f32 %v1993_v7, %v2621_v31  ;;  %v683_v55 = vmul.f32 %v1993_v7, %v2622_v47  ;;  %v2639_v38 = vld [vmem:[#allocation33_spill] sm:$0xff]  ;;  %v2649_v29 = vld [vmem:[#allocation43_spill] sm:$0xff] }
 0x353   : > { %788 = vst [vmem:[%s2021_s23 + $0xd8] sm:$0xff] %v660_v40  ;;  %789 = vst [vmem:[%s2021_s23 + $0xe0] sm:$0xff] %v661_v42  ;;  %v684_v59 = vmul.f32 %v1993_v7, %v2623_v35  ;;  %v685_v27 = vmul.f32 %v1993_v7, %v2624_v19  ;;  %v686_v11 = vmul.f32 %v1993_v7, %v2625_v1  ;;  %v2640_v42 = vld [vmem:[#allocation34_spill] sm:$0xff]  ;;  %v2650_v37 = vld [vmem:[#allocation44_spill] sm:$0xff] }
 0x354   : > { %790 = vst [vmem:[%s2021_s23 + $0xe8] sm:$0xff] %v662_v44  ;;  %791 = vst [vmem:[%s2021_s23 + $0xf0] sm:$0xff] %v663_v46  ;;  %v687_v23 = vmul.f32 %v1993_v7, %v2626_v61  ;;  %v688_v57 = vmul.f32 %v1993_v7, %v2627_v39  ;;  %v689_v63 = vmul.f32 %v1993_v7, %v2628_v51  ;;  %v2641_v46 = vld [vmem:[#allocation35_spill] sm:$0xff]  ;;  %v2651_v45 = vld [vmem:[#allocation45_spill] sm:$0xff] }
 0x355   : > { %792 = vst [vmem:[%s2021_s23 + $0xf8] sm:$0xff] %v664_v48  ;;  %793 = vst [vmem:[%s2021_s23 + $0x100] sm:$0xff] %v665_v50  ;;  %v690_v2 = vmul.f32 %v1993_v7, %v2629_v15  ;;  %v691_v4 = vmul.f32 %v1993_v7, %v2630_v3  ;;  %v692_v8 = vmul.f32 %v1993_v7, %v2631_v6  ;;  %v2642_v50 = vld [vmem:[#allocation36_spill] sm:$0xff]  ;;  %v2652_v31 = vld [vmem:[#allocation46_spill] sm:$0xff] }
 0x356   : > { %794 = vst [vmem:[%s2021_s23 + $0x108] sm:$0xff] %v666_v52  ;;  %795 = vst [vmem:[%s2021_s23 + $0x110] sm:$0xff] %v667_v54  ;;  %v693_v12 = vmul.f32 %v1993_v7, %v2632_v10  ;;  %v694_v16 = vmul.f32 %v1993_v7, %v2633_v14  ;;  %v695_v20 = vmul.f32 %v1993_v7, %v2634_v18  ;;  %v2643_v54 = vld [vmem:[#allocation37_spill] sm:$0xff]  ;;  %v2653_v47 = vld [vmem:[#allocation47_spill] sm:$0xff] }
 0x357   : > { %796 = vst [vmem:[%s2021_s23 + $0x118] sm:$0xff] %v668_v56  ;;  %797 = vst [vmem:[%s2021_s23 + $0x120] sm:$0xff] %v669_v58  ;;  %v696_v24 = vmul.f32 %v1993_v7, %v2635_v22  ;;  %v697_v28 = vmul.f32 %v1993_v7, %v2636_v26  ;;  %v698_v32 = vmul.f32 %v1993_v7, %v2637_v30  ;;  %v2644_v58 = vld [vmem:[#allocation38_spill] sm:$0xff]  ;;  %v2654_v35 = vld [vmem:[#allocation48_spill] sm:$0xff] }
 0x358   : > { %798 = vst [vmem:[%s2021_s23 + $0x128] sm:$0xff] %v670_v60  ;;  %799 = vst [vmem:[%s2021_s23 + $0x130] sm:$0xff] %v671_v62  ;;  %v699_v36 = vmul.f32 %v1993_v7, %v2638_v34  ;;  %v700_v40 = vmul.f32 %v1993_v7, %v2639_v38  ;;  %v701_v44 = vmul.f32 %v1993_v7, %v2640_v42  ;;  %v2645_v62 = vld [vmem:[#allocation39_spill] sm:$0xff]  ;;  %v2655_v19 = vld [vmem:[#allocation49_spill] sm:$0xff] }
 0x359   : > { %800 = vst [vmem:[%s2021_s23 + $0x138] sm:$0xff] %v672_v0  ;;  %801 = vst [vmem:[%s2021_s23 + $0x140] sm:$0xff] %v673_v5  ;;  %v702_v48 = vmul.f32 %v1993_v7, %v2641_v46  ;;  %v703_v52 = vmul.f32 %v1993_v7, %v2642_v50  ;;  %v704_v56 = vmul.f32 %v1993_v7, %v2643_v54  ;;  %v2646_v5 = vld [vmem:[#allocation40_spill] sm:$0xff]  ;;  %v2656_v1 = vld [vmem:[#allocation50_spill] sm:$0xff] }
 0x35a   : > { %802 = vst [vmem:[%s2021_s23 + $0x148] sm:$0xff] %v674_v9  ;;  %803 = vst [vmem:[%s2021_s23 + $0x150] sm:$0xff] %v675_v13  ;;  %v705_v60 = vmul.f32 %v1993_v7, %v2644_v58  ;;  %v706_v0 = vmul.f32 %v1993_v7, %v2645_v62  ;;  %v707_v9 = vmul.f32 %v1993_v7, %v2646_v5  ;;  %v2647_v13 = vld [vmem:[#allocation41_spill] sm:$0xff]  ;;  %v2657_v61 = vld [vmem:[#allocation51_spill] sm:$0xff] }
 0x35b   : > { %804 = vst [vmem:[%s2021_s23 + $0x158] sm:$0xff] %v676_v17  ;;  %805 = vst [vmem:[%s2021_s23 + $0x160] sm:$0xff] %v677_v21  ;;  %v708_v17 = vmul.f32 %v1993_v7, %v2647_v13  ;;  %v2648_v21 = vld [vmem:[#allocation42_spill] sm:$0xff]  ;;  %v2658_v39 = vld [vmem:[#allocation52_spill] sm:$0xff] }
 0x35c   : > { %806 = vst [vmem:[%s2021_s23 + $0x168] sm:$0xff] %v678_v25  ;;  %807 = vst [vmem:[%s2021_s23 + $0x170] sm:$0xff] %v679_v33  ;;  %v709_v25 = vmul.f32 %v1993_v7, %v2648_v21  ;;  %v710_v33 = vmul.f32 %v1993_v7, %v2649_v29  ;;  %v2659_v51 = vld [vmem:[#allocation53_spill] sm:$0xff]  ;;  %v2660_v15 = vld [vmem:[#allocation54_spill] sm:$0xff] }
 0x35d   : > { %808 = vst [vmem:[%s2021_s23 + $0x178] sm:$0xff] %v680_v41  ;;  %809 = vst [vmem:[%s2021_s23 + $0x180] sm:$0xff] %v681_v49  ;;  %v711_v41 = vmul.f32 %v1993_v7, %v2650_v37  ;;  %v712_v49 = vmul.f32 %v1993_v7, %v2651_v45  ;;  %v2661_v3 = vld [vmem:[#allocation55_spill] sm:$0xff]  ;;  %v2662_v6 = vld [vmem:[#allocation56_spill] sm:$0xff] }
 0x35e   : > { %810 = vst [vmem:[%s2021_s23 + $0x188] sm:$0xff] %v682_v53  ;;  %811 = vst [vmem:[%s2021_s23 + $0x190] sm:$0xff] %v683_v55  ;;  %v713_v53 = vmul.f32 %v1993_v7, %v2652_v31  ;;  %v714_v55 = vmul.f32 %v1993_v7, %v2653_v47  ;;  %v2663_v10 = vld [vmem:[#allocation57_spill] sm:$0xff]  ;;  %v2664_v14 = vld [vmem:[#allocation58_spill] sm:$0xff] }
 0x35f   : > { %812 = vst [vmem:[%s2021_s23 + $0x198] sm:$0xff] %v684_v59  ;;  %813 = vst [vmem:[%s2021_s23 + $0x1a0] sm:$0xff] %v685_v27  ;;  %v715_v59 = vmul.f32 %v1993_v7, %v2654_v35  ;;  %v716_v27 = vmul.f32 %v1993_v7, %v2655_v19  ;;  %v2665_v18 = vld [vmem:[#allocation59_spill] sm:$0xff]  ;;  %v2666_v22 = vld [vmem:[#allocation60_spill] sm:$0xff] }
 0x360   : > { %814 = vst [vmem:[%s2021_s23 + $0x1a8] sm:$0xff] %v686_v11  ;;  %815 = vst [vmem:[%s2021_s23 + $0x1b0] sm:$0xff] %v687_v23  ;;  %v717_v11 = vmul.f32 %v1993_v7, %v2656_v1  ;;  %v718_v23 = vmul.f32 %v1993_v7, %v2657_v61  ;;  %v2667_v26 = vld [vmem:[#allocation61_spill] sm:$0xff]  ;;  %v2668_v30 = vld [vmem:[#allocation62_spill] sm:$0xff] }
 0x361   : > { %816 = vst [vmem:[%s2021_s23 + $0x1b8] sm:$0xff] %v688_v57  ;;  %817 = vst [vmem:[%s2021_s23 + $0x1c0] sm:$0xff] %v689_v63  ;;  %v719_v57 = vmul.f32 %v1993_v7, %v2658_v39  ;;  %v720_v63 = vmul.f32 %v1993_v7, %v2659_v51  ;;  %v2669_v34 = vld [vmem:[#allocation63_spill] sm:$0xff]  ;;  %v2670_v38 = vld [vmem:[#allocation64_spill] sm:$0xff] }
 0x362   : > { %818 = vst [vmem:[%s2021_s23 + $0x1c8] sm:$0xff] %v690_v2  ;;  %819 = vst [vmem:[%s2021_s23 + $0x1d0] sm:$0xff] %v691_v4  ;;  %v721_v2 = vmul.f32 %v1993_v7, %v2660_v15  ;;  %v722_v4 = vmul.f32 %v1993_v7, %v2661_v3  ;;  %v2671_v42 = vld [vmem:[#allocation65_spill] sm:$0xff]  ;;  %v2672_v46 = vld [vmem:[#allocation66_spill] sm:$0xff] }
 0x363   : > { %820 = vst [vmem:[%s2021_s23 + $0x1d8] sm:$0xff] %v692_v8  ;;  %821 = vst [vmem:[%s2021_s23 + $0x1e0] sm:$0xff] %v693_v12  ;;  %v723_v8 = vmul.f32 %v1993_v7, %v2662_v6  ;;  %v724_v12 = vmul.f32 %v1993_v7, %v2663_v10  ;;  %v2673_v50 = vld [vmem:[#allocation67_spill] sm:$0xff]  ;;  %v2674_v54 = vld [vmem:[#allocation68_spill] sm:$0xff] }
 0x364   : > { %822 = vst [vmem:[%s2021_s23 + $0x1e8] sm:$0xff] %v694_v16  ;;  %823 = vst [vmem:[%s2021_s23 + $0x1f0] sm:$0xff] %v695_v20  ;;  %v725_v16 = vmul.f32 %v1993_v7, %v2664_v14  ;;  %v726_v20 = vmul.f32 %v1993_v7, %v2665_v18  ;;  %v2675_v58 = vld [vmem:[#allocation69_spill] sm:$0xff]  ;;  %v2676_v62 = vld [vmem:[#allocation70_spill] sm:$0xff] }
 0x365   : > { %824 = vst [vmem:[%s2021_s23 + $0x1f8] sm:$0xff] %v696_v24  ;;  %825 = vst [vmem:[%s2021_s23 + $0x200] sm:$0xff] %v697_v28  ;;  %v727_v24 = vmul.f32 %v1993_v7, %v2666_v22  ;;  %v728_v28 = vmul.f32 %v1993_v7, %v2667_v26  ;;  %v2677_v5 = vld [vmem:[#allocation71_spill] sm:$0xff]  ;;  %v2678_v13 = vld [vmem:[#allocation72_spill] sm:$0xff]  ;;  %v759_v26 = vmul.f32 %v1993_v7, %v1985_v43 }
 0x366   : > { %826 = vst [vmem:[%s2021_s23 + $0x208] sm:$0xff] %v698_v32  ;;  %827 = vst [vmem:[%s2021_s23 + $0x210] sm:$0xff] %v699_v36  ;;  %v729_v32 = vmul.f32 %v1993_v7, %v2668_v30  ;;  %v730_v36 = vmul.f32 %v1993_v7, %v2669_v34  ;;  %v2679_v21 = vld [vmem:[#allocation73_spill] sm:$0xff]  ;;  %v2680_v29 = vld [vmem:[#allocation74_spill] sm:$0xff] }
 0x367   : > { %828 = vst [vmem:[%s2021_s23 + $0x218] sm:$0xff] %v700_v40  ;;  %829 = vst [vmem:[%s2021_s23 + $0x220] sm:$0xff] %v701_v44  ;;  %v731_v40 = vmul.f32 %v1993_v7, %v2670_v38  ;;  %v732_v44 = vmul.f32 %v1993_v7, %v2671_v42  ;;  %v2681_v37 = vld [vmem:[#allocation75_spill] sm:$0xff]  ;;  %v2682_v45 = vld [vmem:[#allocation76_spill] sm:$0xff] }
 0x368   : > { %830 = vst [vmem:[%s2021_s23 + $0x228] sm:$0xff] %v702_v48  ;;  %831 = vst [vmem:[%s2021_s23 + $0x230] sm:$0xff] %v703_v52  ;;  %v733_v48 = vmul.f32 %v1993_v7, %v2672_v46  ;;  %v734_v52 = vmul.f32 %v1993_v7, %v2673_v50  ;;  %v2683_v31 = vld [vmem:[#allocation77_spill] sm:$0xff]  ;;  %v2684_v47 = vld [vmem:[#allocation78_spill] sm:$0xff] }
 0x369   : > { %832 = vst [vmem:[%s2021_s23 + $0x238] sm:$0xff] %v704_v56  ;;  %833 = vst [vmem:[%s2021_s23 + $0x240] sm:$0xff] %v705_v60  ;;  %v735_v56 = vmul.f32 %v1993_v7, %v2674_v54  ;;  %v736_v60 = vmul.f32 %v1993_v7, %v2675_v58  ;;  %v2685_v35 = vld [vmem:[#allocation79_spill] sm:$0xff]  ;;  %v2686_v19 = vld [vmem:[#allocation80_spill] sm:$0xff] }
 0x36a   : > { %834 = vst [vmem:[%s2021_s23 + $0x248] sm:$0xff] %v706_v0  ;;  %835 = vst [vmem:[%s2021_s23 + $0x250] sm:$0xff] %v707_v9  ;;  %v737_v0 = vmul.f32 %v1993_v7, %v2676_v62  ;;  %v738_v9 = vmul.f32 %v1993_v7, %v2677_v5  ;;  %v2687_v1 = vld [vmem:[#allocation81_spill] sm:$0xff]  ;;  %v2688_v61 = vld [vmem:[#allocation82_spill] sm:$0xff] }
 0x36b   : > { %836 = vst [vmem:[%s2021_s23 + $0x258] sm:$0xff] %v708_v17  ;;  %837 = vst [vmem:[%s2021_s23 + $0x260] sm:$0xff] %v709_v25  ;;  %v739_v17 = vmul.f32 %v1993_v7, %v2678_v13  ;;  %v740_v25 = vmul.f32 %v1993_v7, %v2679_v21  ;;  %v2689_v39 = vld [vmem:[#allocation83_spill] sm:$0xff]  ;;  %v2690_v51 = vld [vmem:[#allocation84_spill] sm:$0xff] }
 0x36c   : > { %838 = vst [vmem:[%s2021_s23 + $0x268] sm:$0xff] %v710_v33  ;;  %839 = vst [vmem:[%s2021_s23 + $0x270] sm:$0xff] %v711_v41  ;;  %v741_v33 = vmul.f32 %v1993_v7, %v2680_v29  ;;  %v742_v41 = vmul.f32 %v1993_v7, %v2681_v37  ;;  %v2691_v15 = vld [vmem:[#allocation85_spill] sm:$0xff]  ;;  %v2692_v3 = vld [vmem:[#allocation86_spill] sm:$0xff] }
 0x36d   : > { %840 = vst [vmem:[%s2021_s23 + $0x278] sm:$0xff] %v712_v49  ;;  %841 = vst [vmem:[%s2021_s23 + $0x280] sm:$0xff] %v713_v53  ;;  %v743_v49 = vmul.f32 %v1993_v7, %v2682_v45  ;;  %v744_v53 = vmul.f32 %v1993_v7, %v2683_v31  ;;  %v2693_v6 = vld [vmem:[#allocation87_spill] sm:$0xff]  ;;  %v2694_v10 = vld [vmem:[#allocation88_spill] sm:$0xff] }
 0x36e   : > { %842 = vst [vmem:[%s2021_s23 + $0x288] sm:$0xff] %v714_v55  ;;  %843 = vst [vmem:[%s2021_s23 + $0x290] sm:$0xff] %v715_v59  ;;  %v745_v55 = vmul.f32 %v1993_v7, %v2684_v47  ;;  %v746_v59 = vmul.f32 %v1993_v7, %v2685_v35  ;;  %v2695_v14 = vld [vmem:[#allocation89_spill] sm:$0xff]  ;;  %v2696_v18 = vld [vmem:[#allocation90_spill] sm:$0xff] }
 0x36f   : > { %844 = vst [vmem:[%s2021_s23 + $0x298] sm:$0xff] %v716_v27  ;;  %845 = vst [vmem:[%s2021_s23 + $0x2a0] sm:$0xff] %v717_v11  ;;  %v747_v27 = vmul.f32 %v1993_v7, %v2686_v19  ;;  %v748_v11 = vmul.f32 %v1993_v7, %v2687_v1  ;;  %v2697_v22 = vld [vmem:[#allocation91_spill] sm:$0xff] }
 0x370   : > { %846 = vst [vmem:[%s2021_s23 + $0x2a8] sm:$0xff] %v718_v23  ;;  %847 = vst [vmem:[%s2021_s23 + $0x2b0] sm:$0xff] %v719_v57  ;;  %v749_v23 = vmul.f32 %v1993_v7, %v2688_v61  ;;  %v750_v57 = vmul.f32 %v1993_v7, %v2689_v39 }
 0x371   : > { %848 = vst [vmem:[%s2021_s23 + $0x2b8] sm:$0xff] %v720_v63  ;;  %849 = vst [vmem:[%s2021_s23 + $0x2c0] sm:$0xff] %v721_v2  ;;  %v751_v63 = vmul.f32 %v1993_v7, %v2690_v51  ;;  %v752_v2 = vmul.f32 %v1993_v7, %v2691_v15 }
 0x372   : > { %850 = vst [vmem:[%s2021_s23 + $0x2c8] sm:$0xff] %v722_v4  ;;  %851 = vst [vmem:[%s2021_s23 + $0x2d0] sm:$0xff] %v723_v8  ;;  %v753_v4 = vmul.f32 %v1993_v7, %v2692_v3  ;;  %v754_v8 = vmul.f32 %v1993_v7, %v2693_v6 }
 0x373   : > { %852 = vst [vmem:[%s2021_s23 + $0x2d8] sm:$0xff] %v724_v12  ;;  %853 = vst [vmem:[%s2021_s23 + $0x2e0] sm:$0xff] %v725_v16  ;;  %v755_v12 = vmul.f32 %v1993_v7, %v2694_v10  ;;  %v756_v16 = vmul.f32 %v1993_v7, %v2695_v14 }
 0x374   : > { %854 = vst [vmem:[%s2021_s23 + $0x2e8] sm:$0xff] %v726_v20  ;;  %855 = vst [vmem:[%s2021_s23 + $0x2f0] sm:$0xff] %v727_v24  ;;  %v757_v20 = vmul.f32 %v1993_v7, %v2696_v18  ;;  %v758_v24 = vmul.f32 %v1993_v7, %v2697_v22 }
 0x375   : > { %856 = vst [vmem:[%s2021_s23 + $0x2f8] sm:$0xff] %v728_v28  ;;  %857 = vst [vmem:[%s2021_s23 + $0x300] sm:$0xff] %v729_v32  ;;  %v2698_v28 = vld [vmem:[#allocation92_spill] sm:$0xff] }
 0x376   : > { %858 = vst [vmem:[%s2021_s23 + $0x308] sm:$0xff] %v730_v36  ;;  %859 = vst [vmem:[%s2021_s23 + $0x310] sm:$0xff] %v731_v40  ;;  %v760_v30 = vmul.f32 %v1993_v7, %v2698_v28 }
 0x377   : > { %860 = vst [vmem:[%s2021_s23 + $0x318] sm:$0xff] %v732_v44  ;;  %861 = vst [vmem:[%s2021_s23 + $0x320] sm:$0xff] %v733_v48 }
 0x378   : > { %862 = vst [vmem:[%s2021_s23 + $0x328] sm:$0xff] %v734_v52  ;;  %863 = vst [vmem:[%s2021_s23 + $0x330] sm:$0xff] %v735_v56 }
 0x379   : > { %864 = vst [vmem:[%s2021_s23 + $0x338] sm:$0xff] %v736_v60  ;;  %865 = vst [vmem:[%s2021_s23 + $0x340] sm:$0xff] %v737_v0 }
 0x37a   : > { %866 = vst [vmem:[%s2021_s23 + $0x348] sm:$0xff] %v738_v9  ;;  %867 = vst [vmem:[%s2021_s23 + $0x350] sm:$0xff] %v739_v17 }
 0x37b   : > { %868 = vst [vmem:[%s2021_s23 + $0x358] sm:$0xff] %v740_v25  ;;  %869 = vst [vmem:[%s2021_s23 + $0x360] sm:$0xff] %v741_v33 }
 0x37c   : > { %870 = vst [vmem:[%s2021_s23 + $0x368] sm:$0xff] %v742_v41  ;;  %871 = vst [vmem:[%s2021_s23 + $0x370] sm:$0xff] %v743_v49 }
 0x37d   : > { %872 = vst [vmem:[%s2021_s23 + $0x378] sm:$0xff] %v744_v53  ;;  %873 = vst [vmem:[%s2021_s23 + $0x380] sm:$0xff] %v745_v55 }
 0x37e   : > { %874 = vst [vmem:[%s2021_s23 + $0x388] sm:$0xff] %v746_v59  ;;  %875 = vst [vmem:[%s2021_s23 + $0x390] sm:$0xff] %v747_v27 }
 0x37f   : > { %876 = vst [vmem:[%s2021_s23 + $0x398] sm:$0xff] %v748_v11  ;;  %877 = vst [vmem:[%s2021_s23 + $0x3a0] sm:$0xff] %v749_v23 }
 0x380   : > { %878 = vst [vmem:[%s2021_s23 + $0x3a8] sm:$0xff] %v750_v57  ;;  %879 = vst [vmem:[%s2021_s23 + $0x3b0] sm:$0xff] %v751_v63 }
 0x381   : > { %880 = vst [vmem:[%s2021_s23 + $0x3b8] sm:$0xff] %v752_v2  ;;  %881 = vst [vmem:[%s2021_s23 + $0x3c0] sm:$0xff] %v753_v4 }
 0x382   : > { %882 = vst [vmem:[%s2021_s23 + $0x3c8] sm:$0xff] %v754_v8  ;;  %883 = vst [vmem:[%s2021_s23 + $0x3d0] sm:$0xff] %v755_v12 }
 0x383   : > { %884 = vst [vmem:[%s2021_s23 + $0x3d8] sm:$0xff] %v756_v16  ;;  %885 = vst [vmem:[%s2021_s23 + $0x3e0] sm:$0xff] %v757_v20 }
 0x384   : > { %886 = vst [vmem:[%s2021_s23 + $0x3e8] sm:$0xff] %v758_v24  ;;  %887 = vst [vmem:[%s2021_s23 + $0x3f0] sm:$0xff] %v759_v26 }
 0x385   : > { %888 = vst [vmem:[%s2021_s23 + $0x3f8] sm:$0xff] %v760_v30 }
 0x386   : > { %1207 = shalt.err (!%p1204_p6)
}
 0x387   : > { %s1208_s22 = scalar_lea.hbm %s2368_s8, 16384  ;;  %s1212_s29 = scalar_lea.hbm %s2437_s3, 32768 }
 0x388   : > { %p1209_p12 = scmp.ne.s32.totalorder %s2368_s8, %s1208_s22  ;;  %p1213_p11 = scmp.lt.u32.totalorder %s2368_s8, %s2437_s3 }
 0x389   : > { %p1214_p7 = scmp.lt.u32.totalorder %s1212_s29, %s1208_s22  ;;  %p1216_p8 = scmp.lt.u32.totalorder %s1208_s22, %s2368_s8 }
 0x38a   : > { %p1210_p13 = pnand %p1209_p12, %p2699_p4 }
 0x38b   : > { %p1215_p3 = por %p1214_p7, %p1213_p11 }
 0x38c   : > { %p1211_p1 = pneg %p1210_p13 }
 0x38d   : > { %p1217_p5 = por %p1216_p8, %p1215_p3 }
 0x38f   : > { %p1218_p10 = pnand %p1217_p5, %p1211_p1 }
 0x391   : > { %1221 = shalt.err (!%p1218_p10)
}
 0x392   : > { %s1274_s28 = smov 128   ;;  %s1275_s23 = smov 8  }
 0x393   : > { %1041 = dma.vmem_to_hbm [thread:$0]  (%p2699_p4), %s2370_s30, 16384, %s2368_s8, %s890_s9, %s1274_s28, %s1274_s28, %s1275_s23  }
 0x394 PF: > { %s918_s26 = sand.u32 1, %s1252_s12   ;;  %p2700_p2 = scmp.ne.s32.totalorder %s2527_s25, 0 }
 0x395   : > { %p2701_p0 = scmp.ge.s32.totalorder %s1264_s15, 2  ;;  %s919_s16 = scalar_lea.sflag [#allocation4], %s918_s26 }
 0x397   : > { %p1055_p9 = pnand %p2701_p0, %p2700_p2 }
 0x399   : > { %1247 = dma.done.wait (!%p1055_p9), %s919_s16, 16384  }
 0x39a   : > { %1249 = vsyncadd (!%p1055_p9), %s919_s16, 4294950912  ;;  %p17_p6 = scmp.ge.s32.totalorder %s1321_s18, 4   ;;  %s2702_s12 = smov %s1256_s13 }
 0x39b   : > { %s2703_s13 = smov %s1260_s14  ;;  %s2704_s14 = smov %s1333_s21 }
 0x39c   : > { %s2705_s15 = smov %s1321_s18  ;;  %19 = sbr.rel (!%p17_p6) target bundleno = 6 (0x6), region = 85 }
 0x3a3   :  { %924 = vsyncpa [#allocation3], 1 }
 0x3a4   :  { %926 = vsyncpa [#allocation3 + $0x1], 1 }
 0x3a5   :  { %927 = vsyncpa [#allocation6], 1 }
 0x3a6   :  { %928 = vsyncpa [#allocation4], 1 }
 0x3a7   :  { %930 = vsyncpa [#allocation4 + $0x1], 1 }

</bundles_post_ra>
